<compile_context>
chip_gen: v6e
topology: v6e:2x2x1
jax: 0.10.0
libtpu: 0.0.40
codegen_flags: <defaults>
</compile_context>

<pallas_src>
import functools

import jax
import jax.numpy as jnp
from jax import lax
from jax.experimental import pallas as pl
from jax.experimental.pallas import tpu as pltpu


def _cond_injection_kernel(patches_ref, x_ref, w1p_ref, gamma_ref, beta_ref,
                           gavg_ref, w2_ref, b2_ref, wxx_ref, wxc_ref, bx_ref,
                           seg_ref, segt_ref, out_ref, *, eps):
    f32 = jnp.float32

    # ---- body[0]: 3x3 conv as ONE K = 9*cin matmul (im2col wrapper-side) ---
    # Channels-major everywhere below: (hidden, B_TILE*HW) -> sublane = hidden,
    # lane = batch*spatial, so every vreg is lane-dense.
    h1 = jnp.dot(w1p_ref[...], patches_ref[...],
                 preferred_element_type=f32)                 # (hidden, b*HW)

    # ---- body[1]: GroupNorm ------------------------------------------------
    # Per-image sums via indicator matmuls (MXU, no lane<->sublane relayout),
    # per-group averaging via the precomputed gavg matrix.
    s1 = jnp.dot(h1, seg_ref[...], preferred_element_type=f32)        # (hidden, b)
    s2 = jnp.dot(h1 * h1, seg_ref[...], preferred_element_type=f32)   # (hidden, b)
    mean_b = jnp.dot(gavg_ref[...], s1, preferred_element_type=f32)   # (hidden, b)
    ex2_b = jnp.dot(gavg_ref[...], s2, preferred_element_type=f32)    # (hidden, b)
    var_b = jnp.maximum(ex2_b - mean_b * mean_b, 0.0)   # clamp single-pass var
    inv_std_b = lax.rsqrt(var_b + eps)
    scale_b = inv_std_b * gamma_ref[...]                # (hidden, b)
    shift_b = beta_ref[...] - mean_b * scale_b          # (hidden, b)
    # Broadcast per-image scale/shift back over each image's HW lanes.
    scale = jnp.dot(scale_b, segt_ref[...], preferred_element_type=f32)
    shift = jnp.dot(shift_b, segt_ref[...], preferred_element_type=f32)
    hn = h1 * scale + shift

    # ---- body[2]: SiLU (reciprocal on the EUP slot) --------------------------
    hs = hn * pl.reciprocal(1.0 + jnp.exp(-hn), approx=True)

    # ---- body[3]: 1x1 conv + bias --------------------------------------------
    h2 = jnp.dot(w2_ref[...], hs, preferred_element_type=f32) + b2_ref[...]

    # ---- x_conv on concat([x, cond]) as split-weight matmuls -----------------
    out = (jnp.dot(wxx_ref[...], x_ref[...], preferred_element_type=f32)
           + jnp.dot(wxc_ref[...], h2, preferred_element_type=f32)
           + bx_ref[...])
    out_ref[...] = out.astype(out_ref.dtype)


def _pick_batch_tile(N, HW, cin, fea, hidden, budget_bytes):
    """Images per grid step: as many as fit the VMEM budget (divisor of N)."""
    def step_bytes(b):
        blocks = 4 * b * HW * (9 * cin + fea + hidden)   # DMA'd in/out blocks
        temps = 6 * 4 * b * HW * hidden                  # body activations
        segm = 4 * b * HW * (128 + 8)                    # padded seg / segT
        return 2 * blocks + temps + segm                 # x2: double buffering

    divisors = [d for d in range(1, N + 1) if N % d == 0]
    fitting = [d for d in divisors if step_bytes(d) <= budget_bytes] or [1]
    b = fitting[-1]
    # For realistic N, keep >= 2 (even) grid steps so dimension_semantics=
    # ("parallel",) load-balances v7x's two TensorCores; for tiny N (single-TC
    # v5e/v6e advice) prefer one bigger step over ~0.35us-per-step overhead.
    if b == N and N >= 16:
        smaller = [d for d in fitting if d <= N // 2]
        if smaller:
            b = smaller[-1]
    return b


def cond_injection(x, cond, params, *, groups, eps=1e-5):
    """Pallas equivalent of CondInjection.forward.

    x:    (N, fea, H, W) f32, cond: (N, 8, H, W) f32
    params: w1 (hidden,8,3,3), gamma/beta (hidden,), w2 (hidden,hidden),
            b2 (hidden,), wx (hidden, fea+hidden), bx (hidden,)
    returns (N, hidden, H, W) f32
    """
    N, fea, H, W = x.shape
    cin = cond.shape[1]
    hidden = params["w1"].shape[0]
    assert hidden % groups == 0
    cpg = hidden // groups
    HW = H * W
    f32 = jnp.float32

    # ---- layout plumbing (wrapper-side, pure XLA, no kernel compute) --------
    # im2col: cond -> (9*cin, N*HW) channel-major zero-padded taps.
    cond_pad = jnp.pad(cond.astype(f32), ((0, 0), (0, 0), (1, 1), (1, 1)))
    taps = [cond_pad[:, :, ky:ky + H, kx:kx + W]
            for ky in range(3) for kx in range(3)]            # 9 x (N,cin,H,W)
    patches = jnp.transpose(jnp.stack(taps, axis=1),          # (N,9,cin,H,W)
                            (1, 2, 0, 3, 4)).reshape(9 * cin, N * HW)
    x_cm = jnp.transpose(x.astype(f32), (1, 0, 2, 3)).reshape(fea, N * HW)

    # ---- parameter preprocessing (input-independent) ------------------------
    w1p = jnp.transpose(params["w1"].astype(f32),
                        (0, 2, 3, 1)).reshape(hidden, 9 * cin)   # (out, 9*cin)
    gamma = params["gamma"].astype(f32).reshape(hidden, 1)
    beta = params["beta"].astype(f32).reshape(hidden, 1)
    w2 = params["w2"].astype(f32)                                # (out, in)
    b2 = params["b2"].astype(f32).reshape(hidden, 1)
    wx = params["wx"].astype(f32)
    wxx, wxc = wx[:, :fea], wx[:, fea:]                          # split concat
    bx = params["bx"].astype(f32).reshape(hidden, 1)
    # gavg @ per-channel-sums = per-channel (group-broadcast) means.
    # NOTE: bakes 1/(cpg*HW) -> resolution-specific; rebuilt on every call.
    gind = (jnp.arange(hidden)[:, None] // cpg ==
            jnp.arange(hidden)[None, :] // cpg)
    gavg = gind.astype(f32) / float(cpg * HW)                    # (hidden, hidden)

    # ---- batch tiling --------------------------------------------------------
    VMEM_BUDGET = 20 * 1024 * 1024   # conservative: fits v7x 64 MiB physical
    b_tile = _pick_batch_tile(N, HW, cin, fea, hidden, VMEM_BUDGET)
    grid = (N // b_tile,)
    bhw = b_tile * HW

    # Per-image lane-segment indicators (GroupNorm stats as matmuls).
    seg = (jnp.arange(bhw)[:, None] // HW ==
           jnp.arange(b_tile)[None, :]).astype(f32)              # (b*HW, b)
    segt = jnp.transpose(seg)                                     # (b, b*HW)

    kernel = functools.partial(_cond_injection_kernel, eps=eps)
    args = (patches, x_cm, w1p, gamma, beta, gavg, w2, b2, wxx, wxc, bx,
            seg, segt)

    flops = 2 * N * HW * hidden * (9 * cin + 2 * hidden + fea + 6)
    bytes_accessed = 4 * (sum(int(a.size) for a in args) + N * hidden * HW)

    out_cm = pl.pallas_call(
        kernel,
        out_shape=jax.ShapeDtypeStruct((hidden, N * HW), f32),
        grid=grid,
        in_specs=[
            pl.BlockSpec((9 * cin, bhw), lambda i: (0, i)),   # patches
            pl.BlockSpec((fea, bhw), lambda i: (0, i)),       # x
            pl.BlockSpec((hidden, 9 * cin), lambda i: (0, 0)),
            pl.BlockSpec((hidden, 1), lambda i: (0, 0)),      # gamma
            pl.BlockSpec((hidden, 1), lambda i: (0, 0)),      # beta
            pl.BlockSpec((hidden, hidden), lambda i: (0, 0)),  # gavg
            pl.BlockSpec((hidden, hidden), lambda i: (0, 0)),  # w2
            pl.BlockSpec((hidden, 1), lambda i: (0, 0)),      # b2
            pl.BlockSpec((hidden, fea), lambda i: (0, 0)),    # wxx
            pl.BlockSpec((hidden, hidden), lambda i: (0, 0)),  # wxc
            pl.BlockSpec((hidden, 1), lambda i: (0, 0)),      # bx
            pl.BlockSpec((bhw, b_tile), lambda i: (0, 0)),    # seg
            pl.BlockSpec((b_tile, bhw), lambda i: (0, 0)),    # segT
        ],
        out_specs=pl.BlockSpec((hidden, bhw), lambda i: (0, i)),
        compiler_params=pltpu.CompilerParams(
            dimension_semantics=("parallel",),
            vmem_limit_bytes=48 * 1024 * 1024,   # headroom, still < v7x 64 MiB
        ),
        cost_estimate=pl.CostEstimate(
            flops=flops,
            transcendentals=2 * N * HW * hidden,
            bytes_accessed=bytes_accessed,
        ),
    )(*args)

    # Channels-major (hidden, N*HW) -> NCHW: one small wrapper-side transpose.
    return jnp.transpose(out_cm.reshape(hidden, N, H, W), (1, 0, 2, 3))


def _reference(x, cond, params, groups):
    # Pure-JAX reference mirroring the PyTorch forward semantics.
    f32 = jnp.float32
    h = lax.conv_general_dilated(
        cond.astype(f32), params["w1"].astype(f32), window_strides=(1, 1),
        padding=((1, 1), (1, 1)), dimension_numbers=("NCHW", "OIHW", "NCHW"))
    N, C, H, W = h.shape
    cpg = C // groups
    hg = h.reshape(N, groups, cpg, H, W)
    mean = jnp.mean(hg, axis=(2, 3, 4), keepdims=True)
    var = jnp.mean((hg - mean) ** 2, axis=(2, 3, 4), keepdims=True)
    hg = (hg - mean) / jnp.sqrt(var + 1e-5)
    h = hg.reshape(N, C, H, W) * params["gamma"].reshape(1, C, 1, 1) \
        + params["beta"].reshape(1, C, 1, 1)
    h = h * jax.nn.sigmoid(h)
    h = jnp.einsum("oi,nihw->nohw", params["w2"].astype(f32), h) \
        + params["b2"].reshape(1, -1, 1, 1)
    xc = jnp.concatenate([x.astype(f32), h], axis=1)
    out = jnp.einsum("oi,nihw->nohw", params["wx"].astype(f32), xc) \
        + params["bx"].reshape(1, -1, 1, 1)
    return out


if __name__ == "__main__":
    N, fea, hidden, groups, H, W = 2, 4, 32, 8, 16, 16

    keys = jax.random.split(jax.random.PRNGKey(0), 9)
    x = jax.random.normal(keys[0], (N, fea, H, W), jnp.float32)
    cond = jax.random.normal(keys[1], (N, 8, H, W), jnp.float32)
    params = dict(
        w1=0.1 * jax.random.normal(keys[2], (hidden, 8, 3, 3), jnp.float32),
        gamma=1.0 + 0.1 * jax.random.normal(keys[3], (hidden,), jnp.float32),
        beta=0.1 * jax.random.normal(keys[4], (hidden,), jnp.float32),
        w2=0.1 * jax.random.normal(keys[5], (hidden, hidden), jnp.float32),
        b2=0.1 * jax.random.normal(keys[6], (hidden,), jnp.float32),
        wx=0.1 * jax.random.normal(keys[7], (hidden, fea + hidden), jnp.float32),
        bx=0.1 * jax.random.normal(keys[8], (hidden,), jnp.float32),
    )

    out = cond_injection(x, cond, params, groups=groups)
    out = jax.block_until_ready(out)

    ref = _reference(x, cond, params, groups)
    assert out.shape == (N, hidden, H, W), out.shape
    # Slightly loose tolerance: SiLU uses the EUP approx reciprocal.
    assert jnp.allclose(out, ref, atol=3e-3, rtol=3e-3), \
        float(jnp.max(jnp.abs(out - ref)))

    print("KERNEL_OK")
</pallas_src>

<mosaic_0001>
module attributes {stable_mosaic.version = 11 : i64} {
  func.func @_cond_injection_kernel(%arg0: i32, %arg1: memref<72x512xf32, #tpu.memory_space<vmem>>, %arg2: memref<4x512xf32, #tpu.memory_space<vmem>>, %arg3: memref<32x72xf32, #tpu.memory_space<vmem>>, %arg4: memref<32x1xf32, #tpu.memory_space<vmem>>, %arg5: memref<32x1xf32, #tpu.memory_space<vmem>>, %arg6: memref<32x32xf32, #tpu.memory_space<vmem>>, %arg7: memref<32x32xf32, #tpu.memory_space<vmem>>, %arg8: memref<32x1xf32, #tpu.memory_space<vmem>>, %arg9: memref<32x4xf32, #tpu.memory_space<vmem>>, %arg10: memref<32x32xf32, #tpu.memory_space<vmem>>, %arg11: memref<32x1xf32, #tpu.memory_space<vmem>>, %arg12: memref<512x2xf32, #tpu.memory_space<vmem>>, %arg13: memref<2x512xf32, #tpu.memory_space<vmem>>, %arg14: memref<32x512xf32, #tpu.memory_space<vmem>>) attributes {dimension_semantics = [#tpu.dimension_semantics<parallel>], iteration_bounds = array<i64: 1>, scalar_prefetch = 0 : i64, scratch_operands = 0 : i64, tpu.core_type = #tpu.core_type<tc>, window_params = [{transform_indices = @transform_0, window_bounds = array<i64: 72, 512>}, {transform_indices = @transform_1, window_bounds = array<i64: 4, 512>}, {pipeline_mode = #tpu.pipeline_mode<synchronous>, transform_indices = @transform_2, window_bounds = array<i64: 32, 72>}, {pipeline_mode = #tpu.pipeline_mode<synchronous>, transform_indices = @transform_3, window_bounds = array<i64: 32, 1>}, {pipeline_mode = #tpu.pipeline_mode<synchronous>, transform_indices = @transform_4, window_bounds = array<i64: 32, 1>}, {pipeline_mode = #tpu.pipeline_mode<synchronous>, transform_indices = @transform_5, window_bounds = array<i64: 32, 32>}, {pipeline_mode = #tpu.pipeline_mode<synchronous>, transform_indices = @transform_6, window_bounds = array<i64: 32, 32>}, {pipeline_mode = #tpu.pipeline_mode<synchronous>, transform_indices = @transform_7, window_bounds = array<i64: 32, 1>}, {pipeline_mode = #tpu.pipeline_mode<synchronous>, transform_indices = @transform_8, window_bounds = array<i64: 32, 4>}, {pipeline_mode = #tpu.pipeline_mode<synchronous>, transform_indices = @transform_9, window_bounds = array<i64: 32, 32>}, {pipeline_mode = #tpu.pipeline_mode<synchronous>, transform_indices = @transform_10, window_bounds = array<i64: 32, 1>}, {pipeline_mode = #tpu.pipeline_mode<synchronous>, transform_indices = @transform_11, window_bounds = array<i64: 512, 2>}, {pipeline_mode = #tpu.pipeline_mode<synchronous>, transform_indices = @transform_12, window_bounds = array<i64: 2, 512>}, {transform_indices = @transform_13, window_bounds = array<i64: 32, 512>}]} {
    %c0 = arith.constant 0 : index
    %c0_0 = arith.constant 0 : index
    %0 = vector.load %arg3[%c0, %c0_0] : memref<32x72xf32, #tpu.memory_space<vmem>>, vector<32x72xf32>
    %c0_1 = arith.constant 0 : index
    %c0_2 = arith.constant 0 : index
    %1 = vector.load %arg1[%c0_1, %c0_2] : memref<72x512xf32, #tpu.memory_space<vmem>>, vector<72x512xf32>
    %cst = arith.constant dense<0.000000e+00> : vector<32x512xf32>
    %2 = tpu.matmul %0, %1, %cst {dimension_numbers = #tpu.dot_dimension_numbers<[1], [0], [0], [1], [0, 0, 1, 1], [], []>} : vector<32x72xf32>, vector<72x512xf32>, vector<32x512xf32> -> vector<32x512xf32>
    %c0_3 = arith.constant 0 : index
    %c0_4 = arith.constant 0 : index
    %3 = vector.load %arg12[%c0_3, %c0_4] : memref<512x2xf32, #tpu.memory_space<vmem>>, vector<512x2xf32>
    %cst_5 = arith.constant dense<0.000000e+00> : vector<32x2xf32>
    %4 = tpu.matmul %2, %3, %cst_5 {dimension_numbers = #tpu.dot_dimension_numbers<[1], [0], [0], [1], [0, 0, 1, 1], [], []>} : vector<32x512xf32>, vector<512x2xf32>, vector<32x2xf32> -> vector<32x2xf32>
    %5 = arith.mulf %2, %2 : vector<32x512xf32>
    %c0_6 = arith.constant 0 : index
    %c0_7 = arith.constant 0 : index
    %6 = vector.load %arg12[%c0_6, %c0_7] : memref<512x2xf32, #tpu.memory_space<vmem>>, vector<512x2xf32>
    %cst_8 = arith.constant dense<0.000000e+00> : vector<32x2xf32>
    %7 = tpu.matmul %5, %6, %cst_8 {dimension_numbers = #tpu.dot_dimension_numbers<[1], [0], [0], [1], [0, 0, 1, 1], [], []>} : vector<32x512xf32>, vector<512x2xf32>, vector<32x2xf32> -> vector<32x2xf32>
    %c0_9 = arith.constant 0 : index
    %c0_10 = arith.constant 0 : index
    %8 = vector.load %arg6[%c0_9, %c0_10] : memref<32x32xf32, #tpu.memory_space<vmem>>, vector<32x32xf32>
    %cst_11 = arith.constant dense<0.000000e+00> : vector<32x2xf32>
    %9 = tpu.matmul %8, %4, %cst_11 {dimension_numbers = #tpu.dot_dimension_numbers<[1], [0], [0], [1], [0, 0, 1, 1], [], []>} : vector<32x32xf32>, vector<32x2xf32>, vector<32x2xf32> -> vector<32x2xf32>
    %c0_12 = arith.constant 0 : index
    %c0_13 = arith.constant 0 : index
    %10 = vector.load %arg6[%c0_12, %c0_13] : memref<32x32xf32, #tpu.memory_space<vmem>>, vector<32x32xf32>
    %cst_14 = arith.constant dense<0.000000e+00> : vector<32x2xf32>
    %11 = tpu.matmul %10, %7, %cst_14 {dimension_numbers = #tpu.dot_dimension_numbers<[1], [0], [0], [1], [0, 0, 1, 1], [], []>} : vector<32x32xf32>, vector<32x2xf32>, vector<32x2xf32> -> vector<32x2xf32>
    %12 = arith.mulf %9, %9 : vector<32x2xf32>
    %13 = arith.subf %11, %12 : vector<32x2xf32>
    %cst_15 = arith.constant 0.000000e+00 : f32
    %14 = vector.broadcast %cst_15 : f32 to vector<32x2xf32>
    %15 = arith.maximumf %13, %14 : vector<32x2xf32>
    %cst_16 = arith.constant 9.99999974E-6 : f32
    %16 = vector.broadcast %cst_16 : f32 to vector<32x2xf32>
    %17 = arith.addf %15, %16 : vector<32x2xf32>
    %18 = math.rsqrt %17 : vector<32x2xf32>
    %c0_17 = arith.constant 0 : index
    %c0_18 = arith.constant 0 : index
    %19 = vector.load %arg4[%c0_17, %c0_18] : memref<32x1xf32, #tpu.memory_space<vmem>>, vector<32x1xf32>
    %20 = vector.broadcast %19 : vector<32x1xf32> to vector<32x2xf32>
    %21 = arith.mulf %18, %20 : vector<32x2xf32>
    %c0_19 = arith.constant 0 : index
    %c0_20 = arith.constant 0 : index
    %22 = vector.load %arg5[%c0_19, %c0_20] : memref<32x1xf32, #tpu.memory_space<vmem>>, vector<32x1xf32>
    %23 = arith.mulf %9, %21 : vector<32x2xf32>
    %24 = vector.broadcast %22 : vector<32x1xf32> to vector<32x2xf32>
    %25 = arith.subf %24, %23 : vector<32x2xf32>
    %c0_21 = arith.constant 0 : index
    %c0_22 = arith.constant 0 : index
    %26 = vector.load %arg13[%c0_21, %c0_22] : memref<2x512xf32, #tpu.memory_space<vmem>>, vector<2x512xf32>
    %cst_23 = arith.constant dense<0.000000e+00> : vector<32x512xf32>
    %27 = tpu.matmul %21, %26, %cst_23 {dimension_numbers = #tpu.dot_dimension_numbers<[1], [0], [0], [1], [0, 0, 1, 1], [], []>} : vector<32x2xf32>, vector<2x512xf32>, vector<32x512xf32> -> vector<32x512xf32>
    %c0_24 = arith.constant 0 : index
    %c0_25 = arith.constant 0 : index
    %28 = vector.load %arg13[%c0_24, %c0_25] : memref<2x512xf32, #tpu.memory_space<vmem>>, vector<2x512xf32>
    %cst_26 = arith.constant dense<0.000000e+00> : vector<32x512xf32>
    %29 = tpu.matmul %25, %28, %cst_26 {dimension_numbers = #tpu.dot_dimension_numbers<[1], [0], [0], [1], [0, 0, 1, 1], [], []>} : vector<32x2xf32>, vector<2x512xf32>, vector<32x512xf32> -> vector<32x512xf32>
    %30 = arith.mulf %2, %27 : vector<32x512xf32>
    %31 = arith.addf %30, %29 : vector<32x512xf32>
    %cst_27 = arith.constant 0.000000e+00 : f32
    %32 = vector.broadcast %cst_27 : f32 to vector<32x512xf32>
    %33 = arith.subf %32, %31 : vector<32x512xf32>
    %34 = math.exp %33 : vector<32x512xf32>
    %cst_28 = arith.constant 1.000000e+00 : f32
    %35 = vector.broadcast %cst_28 : f32 to vector<32x512xf32>
    %36 = arith.addf %35, %34 : vector<32x512xf32>
    %37 = tpu.reciprocal %36 {approx = true} : vector<32x512xf32> -> vector<32x512xf32>
    %38 = arith.mulf %31, %37 : vector<32x512xf32>
    %c0_29 = arith.constant 0 : index
    %c0_30 = arith.constant 0 : index
    %39 = vector.load %arg7[%c0_29, %c0_30] : memref<32x32xf32, #tpu.memory_space<vmem>>, vector<32x32xf32>
    %cst_31 = arith.constant dense<0.000000e+00> : vector<32x512xf32>
    %40 = tpu.matmul %39, %38, %cst_31 {dimension_numbers = #tpu.dot_dimension_numbers<[1], [0], [0], [1], [0, 0, 1, 1], [], []>} : vector<32x32xf32>, vector<32x512xf32>, vector<32x512xf32> -> vector<32x512xf32>
    %c0_32 = arith.constant 0 : index
    %c0_33 = arith.constant 0 : index
    %41 = vector.load %arg8[%c0_32, %c0_33] : memref<32x1xf32, #tpu.memory_space<vmem>>, vector<32x1xf32>
    %42 = vector.broadcast %41 : vector<32x1xf32> to vector<32x512xf32>
    %43 = arith.addf %40, %42 : vector<32x512xf32>
    %c0_34 = arith.constant 0 : index
    %c0_35 = arith.constant 0 : index
    %44 = vector.load %arg9[%c0_34, %c0_35] : memref<32x4xf32, #tpu.memory_space<vmem>>, vector<32x4xf32>
    %c0_36 = arith.constant 0 : index
    %c0_37 = arith.constant 0 : index
    %45 = vector.load %arg2[%c0_36, %c0_37] : memref<4x512xf32, #tpu.memory_space<vmem>>, vector<4x512xf32>
    %cst_38 = arith.constant dense<0.000000e+00> : vector<32x512xf32>
    %46 = tpu.matmul %44, %45, %cst_38 {dimension_numbers = #tpu.dot_dimension_numbers<[1], [0], [0], [1], [0, 0, 1, 1], [], []>} : vector<32x4xf32>, vector<4x512xf32>, vector<32x512xf32> -> vector<32x512xf32>
    %c0_39 = arith.constant 0 : index
    %c0_40 = arith.constant 0 : index
    %47 = vector.load %arg10[%c0_39, %c0_40] : memref<32x32xf32, #tpu.memory_space<vmem>>, vector<32x32xf32>
    %cst_41 = arith.constant dense<0.000000e+00> : vector<32x512xf32>
    %48 = tpu.matmul %47, %43, %cst_41 {dimension_numbers = #tpu.dot_dimension_numbers<[1], [0], [0], [1], [0, 0, 1, 1], [], []>} : vector<32x32xf32>, vector<32x512xf32>, vector<32x512xf32> -> vector<32x512xf32>
    %49 = arith.addf %46, %48 : vector<32x512xf32>
    %c0_42 = arith.constant 0 : index
    %c0_43 = arith.constant 0 : index
    %50 = vector.load %arg11[%c0_42, %c0_43] : memref<32x1xf32, #tpu.memory_space<vmem>>, vector<32x1xf32>
    %51 = vector.broadcast %50 : vector<32x1xf32> to vector<32x512xf32>
    %52 = arith.addf %49, %51 : vector<32x512xf32>
    %c0_44 = arith.constant 0 : index
    %c0_45 = arith.constant 0 : index
    %53 = vector.load %arg14[%c0_44, %c0_45] : memref<32x512xf32, #tpu.memory_space<vmem>>, vector<32x512xf32>
    tpu.vector_store %arg14[%c0_44, %c0_45], %52 {strides = array<i32>} : memref<32x512xf32, #tpu.memory_space<vmem>>, vector<32x512xf32>,
    return
  }
  func.func @transform_0(%arg0: i32) -> (i32, i32) {
    %c0_i32 = arith.constant 0 : i32
    %c0_i32_0 = arith.constant 0 : i32
    return %c0_i32, %arg0 : i32, i32
  }
  func.func @transform_1(%arg0: i32) -> (i32, i32) {
    %c0_i32 = arith.constant 0 : i32
    %c0_i32_0 = arith.constant 0 : i32
    return %c0_i32, %arg0 : i32, i32
  }
  func.func @transform_2(%arg0: i32) -> (i32, i32) {
    %c0_i32 = arith.constant 0 : i32
    %c0_i32_0 = arith.constant 0 : i32
    %c0_i32_1 = arith.constant 0 : i32
    return %c0_i32, %c0_i32_0 : i32, i32
  }
  func.func @transform_3(%arg0: i32) -> (i32, i32) {
    %c0_i32 = arith.constant 0 : i32
    %c0_i32_0 = arith.constant 0 : i32
    %c0_i32_1 = arith.constant 0 : i32
    return %c0_i32, %c0_i32_0 : i32, i32
  }
  func.func @transform_4(%arg0: i32) -> (i32, i32) {
    %c0_i32 = arith.constant 0 : i32
    %c0_i32_0 = arith.constant 0 : i32
    %c0_i32_1 = arith.constant 0 : i32
    return %c0_i32, %c0_i32_0 : i32, i32
  }
  func.func @transform_5(%arg0: i32) -> (i32, i32) {
    %c0_i32 = arith.constant 0 : i32
    %c0_i32_0 = arith.constant 0 : i32
    %c0_i32_1 = arith.constant 0 : i32
    return %c0_i32, %c0_i32_0 : i32, i32
  }
  func.func @transform_6(%arg0: i32) -> (i32, i32) {
    %c0_i32 = arith.constant 0 : i32
    %c0_i32_0 = arith.constant 0 : i32
    %c0_i32_1 = arith.constant 0 : i32
    return %c0_i32, %c0_i32_0 : i32, i32
  }
  func.func @transform_7(%arg0: i32) -> (i32, i32) {
    %c0_i32 = arith.constant 0 : i32
    %c0_i32_0 = arith.constant 0 : i32
    %c0_i32_1 = arith.constant 0 : i32
    return %c0_i32, %c0_i32_0 : i32, i32
  }
  func.func @transform_8(%arg0: i32) -> (i32, i32) {
    %c0_i32 = arith.constant 0 : i32
    %c0_i32_0 = arith.constant 0 : i32
    %c0_i32_1 = arith.constant 0 : i32
    return %c0_i32, %c0_i32_0 : i32, i32
  }
  func.func @transform_9(%arg0: i32) -> (i32, i32) {
    %c0_i32 = arith.constant 0 : i32
    %c0_i32_0 = arith.constant 0 : i32
    %c0_i32_1 = arith.constant 0 : i32
    return %c0_i32, %c0_i32_0 : i32, i32
  }
  func.func @transform_10(%arg0: i32) -> (i32, i32) {
    %c0_i32 = arith.constant 0 : i32
    %c0_i32_0 = arith.constant 0 : i32
    %c0_i32_1 = arith.constant 0 : i32
    return %c0_i32, %c0_i32_0 : i32, i32
  }
  func.func @transform_11(%arg0: i32) -> (i32, i32) {
    %c0_i32 = arith.constant 0 : i32
    %c0_i32_0 = arith.constant 0 : i32
    %c0_i32_1 = arith.constant 0 : i32
    return %c0_i32, %c0_i32_0 : i32, i32
  }
  func.func @transform_12(%arg0: i32) -> (i32, i32) {
    %c0_i32 = arith.constant 0 : i32
    %c0_i32_0 = arith.constant 0 : i32
    %c0_i32_1 = arith.constant 0 : i32
    return %c0_i32, %c0_i32_0 : i32, i32
  }
  func.func @transform_13(%arg0: i32) -> (i32, i32) {
    %c0_i32 = arith.constant 0 : i32
    %c0_i32_0 = arith.constant 0 : i32
    return %c0_i32, %arg0 : i32, i32
  }
}

</mosaic_0001>

<bundles_post_ra>
// kernel: tpu_custom_call.1
= control target key start
LH: loop header
LB: loop body
LE: loop exit
PB: predicated region body
PF: predicated region fallthrough
CT: control target
= control target key end

     0   :  { %vm85_vm0 = vcmask 588800   ;;  %v3642_v37 = vmov 0.0   ;;  %s3628_s0 = inlined_call_operand.vmem [shape: f32[72,512], index: 0, kind: input, shape index: {}]   ;;  %s3629_s1 = inlined_call_operand.vmem [shape: f32[4,512], index: 1, kind: input, shape index: {}]   ;;  %s3630_s2 = inlined_call_operand.vmem [shape: f32[32,72], index: 2, kind: input, shape index: {}]   ;;  %s3631_s3 = inlined_call_operand.vmem [shape: f32[32,1], index: 3, kind: input, shape index: {}]   ;;  %s3632_s4 = inlined_call_operand.vmem [shape: f32[32,1], index: 4, kind: input, shape index: {}]   ;;  %s3633_s5 = inlined_call_operand.vmem [shape: f32[32,32], index: 5, kind: input, shape index: {}]   ;;  %s3634_s6 = inlined_call_operand.vmem [shape: f32[32,32], index: 6, kind: input, shape index: {}]   ;;  %s3635_s7 = inlined_call_operand.vmem [shape: f32[32,1], index: 7, kind: input, shape index: {}]   ;;  %s3636_s8 = inlined_call_operand.vmem [shape: f32[32,4], index: 8, kind: input, shape index: {}]   ;;  %s3637_s9 = inlined_call_operand.vmem [shape: f32[32,32], index: 9, kind: input, shape index: {}]   ;;  %s3638_s10 = inlined_call_operand.vmem [shape: f32[32,1], index: 10, kind: input, shape index: {}]   ;;  %s3639_s11 = inlined_call_operand.vmem [shape: f32[512,2], index: 11, kind: input, shape index: {}]   ;;  %s3640_s12 = inlined_call_operand.vmem [shape: f32[2,512], index: 12, kind: input, shape index: {}]   ;;  %s3641_s13 = inlined_call_operand.hbm [shape: f32[32,512], index: 13, kind: output, shape index: {}]  }
   0x1   :  { %v82_v0 = vld [vmem:[%s3628_s0 + $0x108] sm:$0xff]  ;;  %v84_v1 = vld [vmem:[%s3628_s0 + $0x118] sm:$0xff]  ;;  %v81_v2 = vld [vmem:[%s3628_s0 + $0x100] sm:$0xff]  ;;  %162 = vmatprep.mubr.f32.mxu0 %v3642_v37  ;;  %251 = vmatprep.mubr.f32.mxu1 %v3642_v37 }
   0x2   :  { %112 = vmatprep.subr.mxu0 %v82_v0  ;;  %201 = vmatprep.subr.mxu1 %v84_v1  ;;  %v83_v3 = vld [vmem:[%s3628_s0 + $0x110] sm:$0xff]  ;;  %v78_v4 = vld [vmem:[%s3628_s0 + $0xe8] sm:$0xff]  ;;  %v80_v5 = vld [vmem:[%s3628_s0 + $0xf8] sm:$0xff] }
   0x3   :  { %113 = vmatpush1.msra.mxu0 %v81_v2  ;;  %202 = vmatpush1.msra.mxu1 %v83_v3  ;;  %v77_v6 = vld [vmem:[%s3628_s0 + $0xe0] sm:$0xff]  ;;  %v79_v7 = vld [vmem:[%s3628_s0 + $0xf0] sm:$0xff]  ;;  %v74_v8 = vld [vmem:[%s3628_s0 + $0xc8] sm:$0xff] }
   0x4   :  { %114 = vmatprep.subr.mxu0 %v78_v4  ;;  %203 = vmatprep.subr.mxu1 %v80_v5  ;;  %v76_v9 = vld [vmem:[%s3628_s0 + $0xd8] sm:$0xff]  ;;  %v73_v10 = vld [vmem:[%s3628_s0 + $0xc0] sm:$0xff]  ;;  %v75_v11 = vld [vmem:[%s3628_s0 + $0xd0] sm:$0xff] }
   0x5   :  { %115 = vmatpush1.msra.mxu0 %v77_v6  ;;  %204 = vmatpush1.msra.mxu1 %v79_v7  ;;  %v70_v12 = vld [vmem:[%s3628_s0 + $0xa8] sm:$0xff]  ;;  %v72_v13 = vld [vmem:[%s3628_s0 + $0xb8] sm:$0xff]  ;;  %v69_v14 = vld [vmem:[%s3628_s0 + $0xa0] sm:$0xff] }
   0x6   :  { %116 = vmatprep.subr.mxu0 %v74_v8  ;;  %205 = vmatprep.subr.mxu1 %v76_v9  ;;  %v71_v15 = vld [vmem:[%s3628_s0 + $0xb0] sm:$0xff]  ;;  %v66_v16 = vld [vmem:[%s3628_s0 + $0x88] sm:$0xff]  ;;  %v68_v17 = vld [vmem:[%s3628_s0 + $0x98] sm:$0xff] }
   0x7   :  { %117 = vmatpush1.msra.mxu0 %v73_v10  ;;  %206 = vmatpush1.msra.mxu1 %v75_v11  ;;  %v65_v18 = vld [vmem:[%s3628_s0 + $0x80] sm:$0xff]  ;;  %v67_v19 = vld [vmem:[%s3628_s0 + $0x90] sm:$0xff]  ;;  %v62_v20 = vld [vmem:[%s3628_s0 + $0x68] sm:$0xff] }
   0x8   :  { %118 = vmatprep.subr.mxu0 %v70_v12  ;;  %207 = vmatprep.subr.mxu1 %v72_v13  ;;  %v64_v21 = vld [vmem:[%s3628_s0 + $0x78] sm:$0xff]  ;;  %v61_v22 = vld [vmem:[%s3628_s0 + $0x60] sm:$0xff]  ;;  %v63_v23 = vld [vmem:[%s3628_s0 + $0x70] sm:$0xff] }
   0x9   :  { %119 = vmatpush1.msra.mxu0 %v69_v14  ;;  %208 = vmatpush1.msra.mxu1 %v71_v15  ;;  %v58_v24 = vld [vmem:[%s3628_s0 + $0x48] sm:$0xff]  ;;  %v60_v25 = vld [vmem:[%s3628_s0 + $0x58] sm:$0xff]  ;;  %v57_v26 = vld [vmem:[%s3628_s0 + $0x40] sm:$0xff] }
   0xa   :  { %120 = vmatprep.subr.mxu0 %v66_v16  ;;  %209 = vmatprep.subr.mxu1 %v68_v17  ;;  %v59_v27 = vld [vmem:[%s3628_s0 + $0x50] sm:$0xff]  ;;  %v54_v28 = vld [vmem:[%s3628_s0 + $0x28] sm:$0xff]  ;;  %v56_v29 = vld [vmem:[%s3628_s0 + $0x38] sm:$0xff] }
   0xb   :  { %121 = vmatpush1.msra.mxu0 %v65_v18  ;;  %210 = vmatpush1.msra.mxu1 %v67_v19  ;;  %v53_v30 = vld [vmem:[%s3628_s0 + $0x20] sm:$0xff]  ;;  %v55_v31 = vld [vmem:[%s3628_s0 + $0x30] sm:$0xff]  ;;  %v50_v32 = vld [vmem:[%s3628_s0 + $0x8] sm:$0xff] }
   0xc   :  { %122 = vmatprep.subr.mxu0 %v62_v20  ;;  %211 = vmatprep.subr.mxu1 %v64_v21  ;;  %v52_v33 = vld [vmem:[%s3628_s0 + $0x18] sm:$0xff]  ;;  %v49_v34 = vld [vmem:[%s3628_s0] sm:$0xff]  ;;  %v51_v35 = vld [vmem:[%s3628_s0 + $0x10] sm:$0xff] }
   0xd   :  { %123 = vmatpush1.msra.mxu0 %v61_v22  ;;  %212 = vmatpush1.msra.mxu1 %v63_v23  ;;  %v45_v36 = vld [vmem:[%s3630_s2] sm:$0xff]  ;;  %v2779_v38 = vld [vmem:[%s3639_s11 + $0xf8] sm:$0xff]  ;;  %v46_v42 = vld [vmem:[%s3630_s2 + $0x8] sm:$0xff] }
   0xe   :  { %124 = vmatprep.subr.mxu0 %v58_v24  ;;  %213 = vmatprep.subr.mxu1 %v60_v25  ;;  %v2784_v39 = vld [vmem:[%s3639_s11 + $0x1f8] sm:$0xff]  ;;  %v2810_v43 = vld [vmem:[%s3639_s11 + $0xf0] sm:$0xff]  ;;  %v2841_v48 = vld [vmem:[%s3639_s11 + $0xe8] sm:$0xff] }
   0xf   :  { %125 = vmatpush1.msra.mxu0 %v57_v26  ;;  %214 = vmatpush1.msra.mxu1 %v59_v27  ;;  %v2791_v40 = vld [vmem:[%s3639_s11 + $0x78] sm:$0xff]  ;;  %v2815_v44 = vld [vmem:[%s3639_s11 + $0x1f0] sm:$0xff]  ;;  %v2846_v49 = vld [vmem:[%s3639_s11 + $0x1e8] sm:$0xff] }
  0x10   :  { %126 = vmatprep.subr.mxu0 %v54_v28  ;;  %215 = vmatprep.subr.mxu1 %v56_v29  ;;  %v2796_v41 = vld [vmem:[%s3639_s11 + $0x178] sm:$0xff]  ;;  %v2822_v45 = vld [vmem:[%s3639_s11 + $0x70] sm:$0xff]  ;;  %v2853_v50 = vld [vmem:[%s3639_s11 + $0x68] sm:$0xff] }
  0x11   :  { %127 = vmatpush1.msra.mxu0 %v53_v30  ;;  %216 = vmatpush1.msra.mxu1 %v55_v31  ;;  %v2827_v46 = vld [vmem:[%s3639_s11 + $0x170] sm:$0xff]  ;;  %v2858_v51 = vld [vmem:[%s3639_s11 + $0x168] sm:$0xff]  ;;  %v48_v52 = vld [vmem:[%s3630_s2 + $0x18] sm:$0xff] }
  0x12   :  { %128 = vmatprep.subr.mxu0 %v50_v32  ;;  %217 = vmatprep.subr.mxu1 %v52_v33  ;;  %v47_v47 = vld [vmem:[%s3630_s2 + $0x10] sm:$0xff]  ;;  %v2870_v53 = vld [vmem:[%s3639_s11 + $0xe0] sm:$0xff]  ;;  %v2894_v57 = vld [vmem:[%s3639_s11 + $0xd8] sm:$0xff] }
  0x13   :  { %129 = vmatpush1.msra.mxu0 %v49_v34  ;;  %218 = vmatpush1.msra.mxu1 %v51_v35  ;;  %v2875_v54 = vld [vmem:[%s3639_s11 + $0x1e0] sm:$0xff]  ;;  %v2899_v58 = vld [vmem:[%s3639_s11 + $0x1d8] sm:$0xff] }
  0x14   :  { %2194 = vmatmul.mubr.msk.f32.vlgmr.msra.gmra.mxu0 %vm85_vm0, %v45_v36  ;;  %2198 = vmatmul.mubr.msk.f32.vlgmr.msra.gmra.mxu1 %vm85_vm0, %v45_v36  ;;  %v2882_v55 = vld [vmem:[%s3639_s11 + $0x60] sm:$0xff] }
  0x15   :  { %168 = vmatprep.mubr.f32.mxu0 %v3642_v37  ;;  %257 = vmatprep.mubr.f32.mxu1 %v3642_v37  ;;  %v2887_v56 = vld [vmem:[%s3639_s11 + $0x160] sm:$0xff] }
  0x16   :  { %2262 = vmatprep.subr.mxu0 %v2779_v38  ;;  %2306 = vmatprep.subr.mxu1 %v2784_v39 }
  0x17   :  { %2263 = vmatpush3.msra.mxu0 %v2791_v40  ;;  %2307 = vmatpush3.msra.mxu1 %v2796_v41 }
  0x18   :  { %2195 = vmatmul.mubr.msk.f32.gmra.mxu0 %vm85_vm0, %v46_v42  ;;  %2199 = vmatmul.mubr.msk.f32.gmra.mxu1 %vm85_vm0, %v46_v42 }
  0x19   :  { %174 = vmatprep.mubr.f32.mxu0 %v3642_v37  ;;  %263 = vmatprep.mubr.f32.mxu1 %v3642_v37 }
  0x1a   :  { %2264 = vmatprep.subr.mxu0 %v2810_v43  ;;  %2308 = vmatprep.subr.mxu1 %v2815_v44 }
  0x1b   :  { %2265 = vmatpush3.msra.mxu0 %v2822_v45  ;;  %2309 = vmatpush3.msra.mxu1 %v2827_v46 }
  0x1c   :  { %2196 = vmatmul.mubr.msk.f32.gmra.mxu0 %vm85_vm0, %v47_v47  ;;  %2200 = vmatmul.mubr.msk.f32.gmra.mxu1 %vm85_vm0, %v47_v47 }
  0x1d   :  { %180 = vmatprep.mubr.f32.mxu0 %v3642_v37  ;;  %269 = vmatprep.mubr.f32.mxu1 %v3642_v37 }
  0x1e   :  { %2266 = vmatprep.subr.mxu0 %v2841_v48  ;;  %2310 = vmatprep.subr.mxu1 %v2846_v49 }
  0x1f   :  { %2267 = vmatpush3.msra.mxu0 %v2853_v50  ;;  %2311 = vmatpush3.msra.mxu1 %v2858_v51 }
  0x20   :  { %2197 = vmatmul.mubr.msk.f32.gmra.mxu0 %vm85_vm0, %v48_v52  ;;  %2201 = vmatmul.mubr.msk.f32.gmra.mxu1 %vm85_vm0, %v48_v52 }
  0x21   :  { %18 = vsyncpa [#allocation3], 0  ;;  %2268 = vmatprep.subr.mxu0 %v2870_v53  ;;  %2312 = vmatprep.subr.mxu1 %v2875_v54  ;;  %v2906_v59 = vld [vmem:[%s3639_s11 + $0x58] sm:$0xff]  ;;  %v2918_v61 = vld [vmem:[%s3639_s11 + $0xd0] sm:$0xff]  ;;  %vm700_vm1 = vcmask 261120   ;;  %vm995_vm2 = vcmask 1041408  }
  0x22   :  { %v2911_v60 = vld [vmem:[%s3639_s11 + $0x158] sm:$0xff]  ;;  %2269 = vmatpush3.msra.mxu0 %v2882_v55  ;;  %2313 = vmatpush3.msra.mxu1 %v2887_v56  ;;  %v2923_v62 = vld [vmem:[%s3639_s11 + $0x1d0] sm:$0xff]  ;;  %v2942_v1 = vld [vmem:[%s3639_s11 + $0xc8] sm:$0xff]  ;;  %vm982_vm3 = vcmask 15360   ;;  %vm1935_vm4 = vcmask 1043456   ;;  %vm1922_vm5 = vcmask 31744  }
  0x23   :  { %2270 = vmatprep.subr.mxu0 %v2894_v57  ;;  %2314 = vmatprep.subr.mxu1 %v2899_v58  ;;  %v2930_v63 = vld [vmem:[%s3639_s11 + $0x50] sm:$0xff]  ;;  %v2947_v2 = vld [vmem:[%s3639_s11 + $0x1c8] sm:$0xff]  ;;  %v2966_v5 = vld [vmem:[%s3639_s11 + $0xc0] sm:$0xff] }
  0x24   :  { %v2935_v0 = vld [vmem:[%s3639_s11 + $0x150] sm:$0xff]  ;;  %2271 = vmatpush3.msra.mxu0 %v2906_v59  ;;  %2315 = vmatpush3.msra.mxu1 %v2911_v60  ;;  %v2954_v3 = vld [vmem:[%s3639_s11 + $0x48] sm:$0xff]  ;;  %v2971_v6 = vld [vmem:[%s3639_s11 + $0x1c0] sm:$0xff] }
  0x25   :  { %2272 = vmatprep.subr.mxu0 %v2918_v61  ;;  %2316 = vmatprep.subr.mxu1 %v2923_v62  ;;  %v2959_v4 = vld [vmem:[%s3639_s11 + $0x148] sm:$0xff]  ;;  %v2978_v7 = vld [vmem:[%s3639_s11 + $0x40] sm:$0xff]  ;;  %v2990_v9 = vld [vmem:[%s3639_s11 + $0xb8] sm:$0xff] }
  0x26   :  { %2273 = vmatpush3.msra.mxu0 %v2930_v63  ;;  %2317 = vmatpush3.msra.mxu1 %v2935_v0  ;;  %v2983_v8 = vld [vmem:[%s3639_s11 + $0x140] sm:$0xff]  ;;  %v2995_v10 = vld [vmem:[%s3639_s11 + $0x1b8] sm:$0xff]  ;;  %v3014_v13 = vld [vmem:[%s3639_s11 + $0xb0] sm:$0xff] }
  0x27   :  { %2274 = vmatprep.subr.mxu0 %v2942_v1  ;;  %2318 = vmatprep.subr.mxu1 %v2947_v2  ;;  %v3002_v11 = vld [vmem:[%s3639_s11 + $0x38] sm:$0xff]  ;;  %v3019_v14 = vld [vmem:[%s3639_s11 + $0x1b0] sm:$0xff]  ;;  %v3038_v17 = vld [vmem:[%s3639_s11 + $0xa8] sm:$0xff] }
  0x28   :  { %2275 = vmatpush3.msra.mxu0 %v2954_v3  ;;  %2319 = vmatpush3.msra.mxu1 %v2959_v4  ;;  %v3007_v12 = vld [vmem:[%s3639_s11 + $0x138] sm:$0xff]  ;;  %v3026_v15 = vld [vmem:[%s3639_s11 + $0x30] sm:$0xff]  ;;  %v3043_v18 = vld [vmem:[%s3639_s11 + $0x1a8] sm:$0xff] }
  0x29   :  { %2276 = vmatprep.subr.mxu0 %v2966_v5  ;;  %2320 = vmatprep.subr.mxu1 %v2971_v6  ;;  %v3031_v16 = vld [vmem:[%s3639_s11 + $0x130] sm:$0xff]  ;;  %v3050_v19 = vld [vmem:[%s3639_s11 + $0x28] sm:$0xff]  ;;  %v3062_v21 = vld [vmem:[%s3639_s11 + $0xa0] sm:$0xff] }
  0x2a   :  { %2277 = vmatpush3.msra.mxu0 %v2978_v7  ;;  %2321 = vmatpush3.msra.mxu1 %v2983_v8  ;;  %v3055_v20 = vld [vmem:[%s3639_s11 + $0x128] sm:$0xff]  ;;  %v3067_v22 = vld [vmem:[%s3639_s11 + $0x1a0] sm:$0xff]  ;;  %v3086_v25 = vld [vmem:[%s3639_s11 + $0x98] sm:$0xff] }
  0x2b   :  { %2278 = vmatprep.subr.mxu0 %v2990_v9  ;;  %2322 = vmatprep.subr.mxu1 %v2995_v10  ;;  %v3074_v23 = vld [vmem:[%s3639_s11 + $0x20] sm:$0xff]  ;;  %v3091_v26 = vld [vmem:[%s3639_s11 + $0x198] sm:$0xff]  ;;  %v3110_v29 = vld [vmem:[%s3639_s11 + $0x90] sm:$0xff] }
  0x2c   :  { %2279 = vmatpush3.msra.mxu0 %v3002_v11  ;;  %2323 = vmatpush3.msra.mxu1 %v3007_v12  ;;  %v3079_v24 = vld [vmem:[%s3639_s11 + $0x120] sm:$0xff]  ;;  %v3098_v27 = vld [vmem:[%s3639_s11 + $0x18] sm:$0xff]  ;;  %v3115_v30 = vld [vmem:[%s3639_s11 + $0x190] sm:$0xff] }
  0x2d   :  { %2280 = vmatprep.subr.mxu0 %v3014_v13  ;;  %2324 = vmatprep.subr.mxu1 %v3019_v14  ;;  %v3103_v28 = vld [vmem:[%s3639_s11 + $0x118] sm:$0xff]  ;;  %v3122_v31 = vld [vmem:[%s3639_s11 + $0x10] sm:$0xff]  ;;  %v3134_v33 = vld [vmem:[%s3639_s11 + $0x88] sm:$0xff] }
  0x2e   :  { %2281 = vmatpush3.msra.mxu0 %v3026_v15  ;;  %2325 = vmatpush3.msra.mxu1 %v3031_v16  ;;  %v3127_v32 = vld [vmem:[%s3639_s11 + $0x110] sm:$0xff]  ;;  %v3139_v34 = vld [vmem:[%s3639_s11 + $0x188] sm:$0xff]  ;;  %v3162_v42 = vld [vmem:[%s3639_s11 + $0x80] sm:$0xff] }
  0x2f   :  { %2282 = vmatprep.subr.mxu0 %v3038_v17  ;;  %2326 = vmatprep.subr.mxu1 %v3043_v18  ;;  %3651 = vst [vmem:[#allocation5_spill] sm:$0xff] %v3139_v34  ;;  %v3150_v35 = vld [vmem:[%s3639_s11 + $0x8] sm:$0xff]  ;;  %3654 = vst [vmem:[#allocation8_spill] sm:$0xff] %v3162_v42  ;;  %v3167_v47 = vld [vmem:[%s3639_s11 + $0x180] sm:$0xff] }
  0x30   :  { %2283 = vmatpush3.msra.mxu0 %v3050_v19  ;;  %2327 = vmatpush3.msra.mxu1 %v3055_v20  ;;  %3652 = vst [vmem:[#allocation6_spill] sm:$0xff] %v3150_v35  ;;  %v3155_v36 = vld [vmem:[%s3639_s11 + $0x108] sm:$0xff]  ;;  %3655 = vst [vmem:[#allocation9_spill] sm:$0xff] %v3167_v47  ;;  %v3174_v52 = vld [vmem:[%s3639_s11] sm:$0xff] }
  0x31   :  { %2284 = vmatprep.subr.mxu0 %v3062_v21  ;;  %2328 = vmatprep.subr.mxu1 %v3067_v22  ;;  %3653 = vst [vmem:[#allocation7_spill] sm:$0xff] %v3155_v36  ;;  %3656 = vst [vmem:[#allocation10_spill] sm:$0xff] %v3174_v52  ;;  %v3179_v37 = vld [vmem:[%s3639_s11 + $0x100] sm:$0xff] }
  0x32   :  { %2285 = vmatpush3.msra.mxu0 %v3074_v23  ;;  %2329 = vmatpush3.msra.mxu1 %v3079_v24  ;;  %3657 = vst [vmem:[#allocation11_spill] sm:$0xff] %v3179_v37 }
  0x33   :  { %2286 = vmatprep.subr.mxu0 %v3086_v25  ;;  %2330 = vmatprep.subr.mxu1 %v3091_v26 }
  0x34   :  { %2287 = vmatpush3.msra.mxu0 %v3098_v27  ;;  %2331 = vmatpush3.msra.mxu1 %v3103_v28 }
  0x35   :  { %2288 = vmatprep.subr.mxu0 %v3110_v29  ;;  %2332 = vmatprep.subr.mxu1 %v3115_v30 }
  0x36   :  { %2289 = vmatpush3.msra.mxu0 %v3122_v31  ;;  %2333 = vmatpush3.msra.mxu1 %v3127_v32 }
  0x37   :  { %2290 = vmatprep.subr.mxu0 %v3134_v33  ;;  %2334 = vmatprep.subr.mxu1 %v3139_v34 }
  0x38   :  { %2291 = vmatpush3.msra.mxu0 %v3150_v35  ;;  %2335 = vmatpush3.msra.mxu1 %v3155_v36 }
  0x39   :  { %2292 = vmatprep.subr.mxu0 %v3162_v42  ;;  %2336 = vmatprep.subr.mxu1 %v3167_v47 }
  0x3a   :  { %2293 = vmatpush3.msra.mxu0 %v3174_v52  ;;  %2337 = vmatpush3.msra.mxu1 %v3179_v37 }
  0x3b   :  { %2350 = vmatprep.subr.mxu0 %v2779_v38  ;;  %2394 = vmatprep.subr.mxu1 %v2784_v39 }
  0xd4   :  { %v3185_v42 = vpop.f32.mrf.mxu0  ;;  %v3187_v47 = vpop.f32.mrf.mxu1 }
  0xd6   :  { %v3189_v36 = vpop.f32.mrf.mxu0  ;;  %v3191_v35 = vpop.f32.mrf.mxu1 }
  0xd7   :  { %404 = vmatprep.mubr.f32.mxu0 %v3189_v36  ;;  %489 = vmatprep.mubr.f32.mxu1 %v3191_v35 }
  0xd8   :  { %v3195_v34 = vpop.f32.mrf.mxu0  ;;  %v3197_v52 = vpop.f32.mrf.mxu1  ;;  %405 = vmatmul.mubr.f32.vlgmr.msra.gmra.mxu0 %v3185_v42  ;;  %490 = vmatmul.mubr.f32.vlgmr.msra.gmra.mxu1 %v3187_v47 }
  0xd9   :  { %2351 = vmatpush3.msra.mxu0 %v2791_v40  ;;  %2395 = vmatpush3.msra.mxu1 %v2796_v41 }
  0xda   :  { %2352 = vmatprep.subr.mxu0 %v2810_v43  ;;  %2396 = vmatprep.subr.mxu1 %v2815_v44  ;;  %v3205_v38 = vpop.f32.mrf.mxu0  ;;  %v3207_v39 = vpop.f32.mrf.mxu1 }
  0xdb   :  { %2353 = vmatpush3.msra.mxu0 %v2822_v45  ;;  %2397 = vmatpush3.msra.mxu1 %v2827_v46 }
  0xdc   :  { %409 = vmatprep.mubr.f32.mxu0 %v3205_v38  ;;  %494 = vmatprep.mubr.f32.mxu1 %v3207_v39  ;;  %v3213_v37 = vpop.f32.mrf.mxu0  ;;  %v3215_v40 = vpop.f32.mrf.mxu1 }
  0xdd   :  { %2354 = vmatprep.subr.mxu0 %v2841_v48  ;;  %2398 = vmatprep.subr.mxu1 %v2846_v49  ;;  %v511_v49 = vmul.f32 %v3189_v36, %v3189_v36 }
  0xde   :  { %410 = vmatmul.mubr.f32.gmra.mxu0 %v3195_v34  ;;  %495 = vmatmul.mubr.f32.gmra.mxu1 %v3197_v52  ;;  %v3221_v41 = vpop.f32.mrf.mxu0  ;;  %v3223_v43 = vpop.f32.mrf.mxu1 }
  0xdf   :  { %2355 = vmatpush3.msra.mxu0 %v2853_v50  ;;  %2399 = vmatpush3.msra.mxu1 %v2858_v51  ;;  %v513_v50 = vmul.f32 %v3191_v35, %v3191_v35  ;;  %v3658_v51 = vld [vmem:[#allocation5_spill] sm:$0xff] }
  0xe0   :  { %2356 = vmatprep.subr.mxu0 %v2870_v53  ;;  %2400 = vmatprep.subr.mxu1 %v2875_v54  ;;  %v3231_v44 = vpop.f32.mrf.mxu0  ;;  %v3233_v45 = vpop.f32.mrf.mxu1  ;;  %v3659_v53 = vld [vmem:[#allocation6_spill] sm:$0xff]  ;;  %v3660_v54 = vld [vmem:[#allocation7_spill] sm:$0xff] }
  0xe1   :  { %2357 = vmatpush3.msra.mxu0 %v2882_v55  ;;  %2401 = vmatpush3.msra.mxu1 %v2887_v56  ;;  %v510_v55 = vmul.f32 %v3185_v42, %v3185_v42  ;;  %v512_v56 = vmul.f32 %v3187_v47, %v3187_v47 }
  0xe2   :  { %414 = vmatprep.mubr.f32.mxu0 %v3221_v41  ;;  %499 = vmatprep.mubr.f32.mxu1 %v3223_v43  ;;  %v3243_v46 = vpop.f32.mrf.mxu0  ;;  %v3245_v48 = vpop.f32.mrf.mxu1 }
  0xe3   :  { %2358 = vmatprep.subr.mxu0 %v2894_v57  ;;  %2402 = vmatprep.subr.mxu1 %v2899_v58  ;;  %v3661_v57 = vld [vmem:[#allocation8_spill] sm:$0xff]  ;;  %v3662_v58 = vld [vmem:[#allocation9_spill] sm:$0xff] }
  0xe4   :  { %415 = vmatmul.mubr.f32.gmra.mxu0 %v3213_v37  ;;  %500 = vmatmul.mubr.f32.gmra.mxu1 %v3215_v40 }
  0xe5   :  { %2359 = vmatpush3.msra.mxu0 %v2906_v59  ;;  %2403 = vmatpush3.msra.mxu1 %v2911_v60  ;;  %v515_v59 = vmul.f32 %v3205_v38, %v3205_v38  ;;  %v517_v60 = vmul.f32 %v3207_v39, %v3207_v39 }
  0xe6   :  { %2360 = vmatprep.subr.mxu0 %v2918_v61  ;;  %2404 = vmatprep.subr.mxu1 %v2923_v62  ;;  %v3663_v61 = vld [vmem:[#allocation10_spill] sm:$0xff]  ;;  %v3664_v62 = vld [vmem:[#allocation11_spill] sm:$0xff] }
  0xe7   :  { %2361 = vmatpush3.msra.mxu0 %v2930_v63  ;;  %2405 = vmatpush3.msra.mxu1 %v2935_v0  ;;  %v514_v63 = vmul.f32 %v3195_v34, %v3195_v34  ;;  %v516_v0 = vmul.f32 %v3197_v52, %v3197_v52 }
  0xe8   :  { %419 = vmatprep.mubr.f32.mxu0 %v3243_v46  ;;  %504 = vmatprep.mubr.f32.mxu1 %v3245_v48 }
  0xe9   :  { %2362 = vmatprep.subr.mxu0 %v2942_v1  ;;  %2406 = vmatprep.subr.mxu1 %v2947_v2  ;;  %v519_v1 = vmul.f32 %v3221_v41, %v3221_v41  ;;  %v521_v2 = vmul.f32 %v3223_v43, %v3223_v43 }
  0xea   :  { %420 = vmatmul.mubr.f32.gmra.mxu0 %v3231_v44  ;;  %505 = vmatmul.mubr.f32.gmra.mxu1 %v3233_v45 }
  0xeb   :  { %2363 = vmatpush3.msra.mxu0 %v2954_v3  ;;  %2407 = vmatpush3.msra.mxu1 %v2959_v4  ;;  %v518_v3 = vmul.f32 %v3213_v37, %v3213_v37  ;;  %v520_v4 = vmul.f32 %v3215_v40, %v3215_v40 }
  0xec   :  { %2364 = vmatprep.subr.mxu0 %v2966_v5  ;;  %590 = vmatprep.mubr.f32.mxu0 %v511_v49  ;;  %v523_v5 = vmul.f32 %v3243_v46, %v3243_v46 }
  0xed   :  { %2408 = vmatprep.subr.mxu1 %v2971_v6  ;;  %675 = vmatprep.mubr.f32.mxu1 %v513_v50  ;;  %v525_v6 = vmul.f32 %v3245_v48, %v3245_v48 }
  0xee   :  { %2365 = vmatpush3.msra.mxu0 %v2978_v7  ;;  %2409 = vmatpush3.msra.mxu1 %v2983_v8  ;;  %v522_v7 = vmul.f32 %v3231_v44, %v3231_v44  ;;  %v524_v8 = vmul.f32 %v3233_v45, %v3233_v45 }
  0xef   :  { %2366 = vmatprep.subr.mxu0 %v2990_v9  ;;  %2410 = vmatprep.subr.mxu1 %v2995_v10  ;;  %v696_v9 = vld [vmem:[%s3633_s5] sm:$0xff] }
  0xf0   :  { %2367 = vmatpush3.msra.mxu0 %v3002_v11  ;;  %2411 = vmatpush3.msra.mxu1 %v3007_v12  ;;  %v903_v10 = vld [vmem:[%s3631_s3] sm:$0xff]  ;;  %v905_v11 = vld [vmem:[%s3631_s3 + $0x10] sm:$0xff]  ;;  %v2588_v12 = vmov 0  }
  0xf1   :  { %2368 = vmatprep.subr.mxu0 %v3014_v13  ;;  %2412 = vmatprep.subr.mxu1 %v3019_v14  ;;  %v904_v13 = vld [vmem:[%s3631_s3 + $0x8] sm:$0xff]  ;;  %v906_v14 = vld [vmem:[%s3631_s3 + $0x18] sm:$0xff] }
  0xf2   :  { %2369 = vmatpush3.msra.mxu0 %v3026_v15  ;;  %2413 = vmatpush3.msra.mxu1 %v3031_v16  ;;  %v931_v15 = vld [vmem:[%s3632_s4] sm:$0xff]  ;;  %v932_v16 = vld [vmem:[%s3632_s4 + $0x8] sm:$0xff] }
  0xf3   :  { %2370 = vmatprep.subr.mxu0 %v3038_v17  ;;  %2414 = vmatprep.subr.mxu1 %v3043_v18  ;;  %v933_v17 = vld [vmem:[%s3632_s4 + $0x10] sm:$0xff]  ;;  %v934_v18 = vld [vmem:[%s3632_s4 + $0x18] sm:$0xff] }
  0xf4   :  { %2371 = vmatpush3.msra.mxu0 %v3050_v19  ;;  %2415 = vmatpush3.msra.mxu1 %v3055_v20  ;;  %v1507_v19 = vld [vmem:[%s3635_s7 + $0x18] sm:$0xff]  ;;  %v1506_v20 = vld [vmem:[%s3635_s7 + $0x10] sm:$0xff] }
  0xf5   :  { %2372 = vmatprep.subr.mxu0 %v3062_v21  ;;  %2416 = vmatprep.subr.mxu1 %v3067_v22  ;;  %v1505_v21 = vld [vmem:[%s3635_s7 + $0x8] sm:$0xff]  ;;  %v1504_v22 = vld [vmem:[%s3635_s7] sm:$0xff] }
  0xf6   :  { %2373 = vmatpush3.msra.mxu0 %v3074_v23  ;;  %2417 = vmatpush3.msra.mxu1 %v3079_v24  ;;  %v2122_v23 = vld [vmem:[%s3638_s10] sm:$0xff]  ;;  %v2123_v24 = vld [vmem:[%s3638_s10 + $0x8] sm:$0xff] }
  0xf7   :  { %2374 = vmatprep.subr.mxu0 %v3086_v25  ;;  %2418 = vmatprep.subr.mxu1 %v3091_v26  ;;  %v2124_v25 = vld [vmem:[%s3638_s10 + $0x10] sm:$0xff]  ;;  %v2125_v26 = vld [vmem:[%s3638_s10 + $0x18] sm:$0xff] }
  0xf8   :  { %2375 = vmatpush3.msra.mxu0 %v3098_v27  ;;  %2419 = vmatpush3.msra.mxu1 %v3103_v28 }
  0xf9   :  { %2376 = vmatprep.subr.mxu0 %v3110_v29  ;;  %2420 = vmatprep.subr.mxu1 %v3115_v30 }
  0xfa   :  { %2377 = vmatpush3.msra.mxu0 %v3122_v31  ;;  %2421 = vmatpush3.msra.mxu1 %v3127_v32 }
  0xfb   :  { %2378 = vmatprep.subr.mxu0 %v3134_v33  ;;  %2422 = vmatprep.subr.mxu1 %v3658_v51 }
  0xfc   :  { %2379 = vmatpush3.msra.mxu0 %v3659_v53  ;;  %2423 = vmatpush3.msra.mxu1 %v3660_v54 }
  0xfd   :  { %2380 = vmatprep.subr.mxu0 %v3661_v57  ;;  %2424 = vmatprep.subr.mxu1 %v3662_v58 }
  0xfe   :  { %2381 = vmatpush3.msra.mxu0 %v3663_v61  ;;  %2425 = vmatpush3.msra.mxu1 %v3664_v62 }
  0xff   :  { %591 = vmatmul.mubr.f32.vlgmr.msra.gmra.mxu0 %v510_v55  ;;  %676 = vmatmul.mubr.f32.vlgmr.msra.gmra.mxu1 %v512_v56 }
 0x100   :  { %595 = vmatprep.mubr.f32.mxu0 %v515_v59  ;;  %680 = vmatprep.mubr.f32.mxu1 %v517_v60 }
 0x101   :  { %2488 = vset.pattern.permute.xlu0 %v2588_v12  ;;  %2489 = vset.pattern.permute.xlu1 %v2588_v12 }
 0x102   :  { %909 = vperm.xlu0 %2488, %v903_v10   ;;  %919 = vperm.xlu1 %2489, %v905_v11   ;;  %v3665_v10 = vmov 0.0  }
 0x103   :  { %596 = vmatmul.mubr.f32.gmra.mxu0 %v514_v63  ;;  %681 = vmatmul.mubr.f32.gmra.mxu1 %v516_v0 }
 0x104   :  { %600 = vmatprep.mubr.f32.mxu0 %v519_v1  ;;  %685 = vmatprep.mubr.f32.mxu1 %v521_v2 }
 0x106   :  { %914 = vperm.xlu0 %2488, %v904_v13   ;;  %924 = vperm.xlu1 %2489, %v906_v14  }
 0x107   :  { %601 = vmatmul.mubr.f32.gmra.mxu0 %v518_v3  ;;  %686 = vmatmul.mubr.f32.gmra.mxu1 %v520_v4 }
 0x108   :  { %605 = vmatprep.mubr.f32.mxu0 %v523_v5  ;;  %690 = vmatprep.mubr.f32.mxu1 %v525_v6 }
 0x10a   :  { %941 = vperm.xlu0 %2488, %v931_v15   ;;  %946 = vperm.xlu1 %2489, %v932_v16  }
 0x10b   :  { %606 = vmatmul.mubr.f32.gmra.mxu0 %v522_v7  ;;  %691 = vmatmul.mubr.f32.gmra.mxu1 %v524_v8  ;;  %v697_v7 = vld [vmem:[%s3633_s5 + $0x8] sm:$0xff]  ;;  %v698_v8 = vld [vmem:[%s3633_s5 + $0x10] sm:$0xff] }
 0x10c   :  { %2462 = vmatprep.mubr.msk.f32.mxu0 %vm700_vm1, %v696_v9  ;;  %2476 = vmatprep.mubr.msk.f32.mxu1 %vm700_vm1, %v696_v9  ;;  %v699_v9 = vld [vmem:[%s3633_s5 + $0x18] sm:$0xff] }
 0x10e   :  { %951 = vperm.xlu0 %2488, %v933_v17   ;;  %956 = vperm.xlu1 %2489, %v934_v18  }
 0x112   :  { %1525 = vperm.xlu0 %2488, %v1507_v19   ;;  %1520 = vperm.xlu1 %2489, %v1506_v20  }
 0x116   :  { %1515 = vperm.xlu0 %2488, %v1505_v21   ;;  %1510 = vperm.xlu1 %2489, %v1504_v22  }
 0x11a   :  { %2128 = vperm.xlu0 %2488, %v2122_v23   ;;  %2133 = vperm.xlu1 %2489, %v2123_v24  }
 0x11e   :  { %2138 = vperm.xlu0 %2488, %v2124_v25   ;;  %2143 = vperm.xlu1 %2489, %v2125_v26  }
 0x198   :  { %v2294_v27 = vpop.f32.mrf.mxu0  ;;  %v2338_v28 = vpop.f32.mrf.mxu1 }
 0x19a   :  { %v2295_v29 = vpop.f32.mrf.mxu0  ;;  %v2339_v30 = vpop.f32.mrf.mxu1 }
 0x19b   :  { %v2296_v3 = vadd.f32 %v2295_v29, %v2294_v27  ;;  %v2340_v4 = vadd.f32 %v2339_v30, %v2338_v28 }
 0x19d   :  { %v492_v6 = vadd.f32 %v2340_v4, %v2296_v3 }
 0x19e   :  { %v2297_v31 = vpop.f32.mrf.mxu0  ;;  %v2341_v32 = vpop.f32.mrf.mxu1 }
 0x1a0   :  { %v2298_v33 = vpop.f32.mrf.mxu0  ;;  %v2342_v49 = vpop.f32.mrf.mxu1 }
 0x1a1   :  { %v2299_v63 = vadd.f32 %v2298_v33, %v2297_v31  ;;  %v2343_v0 = vadd.f32 %v2342_v49, %v2341_v32 }
 0x1a3   :  { %v497_v5 = vadd.f32 %v2343_v0, %v2299_v63 }
 0x1a4   :  { %v2300_v50 = vpop.f32.mrf.mxu0  ;;  %v2344_v51 = vpop.f32.mrf.mxu1 }
 0x1a6   :  { %v2301_v53 = vpop.f32.mrf.mxu0  ;;  %v2345_v54 = vpop.f32.mrf.mxu1 }
 0x1a7   :  { %v2302_v57 = vadd.f32 %v2301_v53, %v2300_v50  ;;  %v2346_v58 = vadd.f32 %v2345_v54, %v2344_v51 }
 0x1a9   :  { %v502_v1 = vadd.f32 %v2346_v58, %v2302_v57  ;;  %v969_v57 = vlaneseq }
 0x1aa   :  { %v2303_v55 = vpop.f32.mrf.mxu0  ;;  %v2347_v56 = vpop.f32.mrf.mxu1 }
 0x1ac   :  { %v2304_v59 = vpop.f32.mrf.mxu0  ;;  %v2348_v60 = vpop.f32.mrf.mxu1 }
 0x1ad   :  { %v2305_v61 = vadd.f32 %v2304_v59, %v2303_v55  ;;  %v2349_v62 = vadd.f32 %v2348_v60, %v2347_v56  ;;  %v2589_v55 = vmov 1983009808   ;;  %v970_v59 = vshrl.u32 %v969_v57, 7  ;;  %v963_v60 = vld [vmem:[%s3640_s12] sm:$0xff] }
 0x1ae   :  { %v967_v56 = vunpack.c.l.s4 %v2589_v55 }
 0x1af   :  { %v507_v2 = vadd.f32 %v2349_v62, %v2305_v61  ;;  %v965_v62 = vcombine.high %v963_v60, %v963_v60 }
 0x1b0   :  { %v968_v58 = vunpack.c.0.s8 %v967_v56 }
 0x1b1   :  { %2454 = vmatprep.subr.mxu0 %v507_v2 }
 0x1b2   :  { %2455 = vmatpush3.msra.mxu0 %v507_v2  ;;  %v971_v61 = vsub.s32 %v968_v58, %v970_v59 }
 0x1b3   :  { %2456 = vmatprep.subr.mxu0 %v502_v1 }
 0x1b4   :  { %2457 = vmatpush3.msra.mxu0 %v502_v1  ;;  %v972_v63 = vrot.slane %v963_v60, %v971_v61  ;;  %v979_v0 = vrot.slane %v965_v62, %v971_v61 }
 0x1b5   :  { %2458 = vmatprep.subr.mxu0 %v497_v5 }
 0x1b6   :  { %2459 = vmatpush3.msra.mxu0 %v497_v5  ;;  %v980_v1 = vcombine.high %v972_v63, %v972_v63  ;;  %v981_v2 = vcombine.high %v979_v0, %v979_v0 }
 0x1b7   :  { %2460 = vmatprep.subr.mxu0 %v492_v6 }
 0x1b8   :  { %2461 = vmatpush3.msra.mxu0 %v492_v6 }
 0x1b9   :  { %2463 = vmatmul.mubr.msk.f32.vlgmr.msra.gmra.mxu0 %vm700_vm1, %v697_v7  ;;  %2210 = vmatprep.subr.msk.mxu0 %vm995_vm2, %v980_v1 }
 0x1ba   :  { %2465 = vmatprep.mubr.msk.f32.mxu0 %vm700_vm1, %v698_v8  ;;  %2211 = vmatpush1.msk.msra.mxu0 %vm995_vm2, %v972_v63 }
 0x1bb   :  { %2222 = vmatprep.subr.msk.mxu0 %vm995_vm2, %v980_v1 }
 0x1bd   :  { %2466 = vmatmul.mubr.msk.f32.gmra.mxu0 %vm700_vm1, %v699_v9 }
 0x1be   :  { %1068 = vmatprep.mubr.f32.mxu0 %v3665_v10 }
 0x1bf   :  { %v2382_v11 = vpop.f32.mrf.mxu0  ;;  %v2426_v12 = vpop.f32.mrf.mxu1 }
 0x1c1   :  { %v2383_v13 = vpop.f32.mrf.mxu0  ;;  %v2427_v14 = vpop.f32.mrf.mxu1 }
 0x1c2   :  { %v2384_v49 = vadd.f32 %v2383_v13, %v2382_v11  ;;  %v2428_v50 = vadd.f32 %v2427_v14, %v2426_v12 }
 0x1c3   :  { %v2385_v15 = vpop.f32.mrf.mxu0  ;;  %v2429_v16 = vpop.f32.mrf.mxu1 }
 0x1c4   :  { %v678_v54 = vadd.f32 %v2428_v50, %v2384_v49  ;;  %v920_v50 = vpop.permute.xlu1 %919 }
 0x1c5   :  { %v2386_v17 = vpop.f32.mrf.mxu0  ;;  %v2430_v18 = vpop.f32.mrf.mxu1 }
 0x1c6   :  { %v2387_v31 = vadd.f32 %v2386_v17, %v2385_v15  ;;  %v2431_v32 = vadd.f32 %v2430_v18, %v2429_v16 }
 0x1c7   :  { %v2388_v19 = vpop.f32.mrf.mxu0  ;;  %v2432_v20 = vpop.f32.mrf.mxu1 }
 0x1c8   :  { %v683_v53 = vadd.f32 %v2431_v32, %v2387_v31 }
 0x1c9   :  { %v2389_v21 = vpop.f32.mrf.mxu0  ;;  %v2433_v22 = vpop.f32.mrf.mxu1 }
 0x1ca   :  { %v2390_v27 = vadd.f32 %v2389_v21, %v2388_v19  ;;  %v2434_v28 = vadd.f32 %v2433_v22, %v2432_v20 }
 0x1cb   :  { %v2391_v23 = vpop.f32.mrf.mxu0  ;;  %v2435_v24 = vpop.f32.mrf.mxu1 }
 0x1cc   :  { %v688_v51 = vadd.f32 %v2434_v28, %v2390_v27  ;;  %v910_v28 = vpop.permute.xlu0 %909 }
 0x1cd   :  { %v2392_v25 = vpop.f32.mrf.mxu0  ;;  %v2436_v26 = vpop.f32.mrf.mxu1 }
 0x1ce   :  { %v2393_v29 = vadd.f32 %v2392_v25, %v2391_v23  ;;  %v2437_v30 = vadd.f32 %v2436_v26, %v2435_v24 }
 0x1d0   :  { %v693_v33 = vadd.f32 %v2437_v30, %v2393_v29  ;;  %v915_v32 = vpop.permute.xlu0 %914 }
 0x1d2   :  { %2468 = vmatprep.subr.mxu1 %v693_v33 }
 0x1d3   :  { %2469 = vmatpush3.msra.mxu1 %v693_v33 }
 0x1d4   :  { %2470 = vmatprep.subr.mxu1 %v688_v51  ;;  %v942_v57 = vpop.permute.xlu0 %941 }
 0x1d5   :  { %2471 = vmatpush3.msra.mxu1 %v688_v51 }
 0x1d6   :  { %2472 = vmatprep.subr.mxu1 %v683_v53 }
 0x1d7   :  { %2473 = vmatpush3.msra.mxu1 %v683_v53 }
 0x1d8   :  { %2474 = vmatprep.subr.mxu1 %v678_v54 }
 0x1d9   :  { %2475 = vmatpush3.msra.mxu1 %v678_v54  ;;  %v925_v54 = vpop.permute.xlu1 %924 }
 0x1da   :  { %2477 = vmatmul.mubr.msk.f32.vlgmr.msra.gmra.mxu1 %vm700_vm1, %v697_v7  ;;  %2216 = vmatprep.subr.msk.mxu1 %vm995_vm2, %v981_v2 }
 0x1db   :  { %2479 = vmatprep.mubr.msk.f32.mxu1 %vm700_vm1, %v698_v8  ;;  %2217 = vmatpush1.msk.msra.mxu1 %vm995_vm2, %v979_v0 }
 0x1dc   :  { %2228 = vmatprep.subr.msk.mxu1 %vm995_vm2, %v981_v2 }
 0x1dd   :  { %v947_v60 = vpop.permute.xlu1 %946 }
 0x1de   :  { %2480 = vmatmul.mubr.msk.f32.gmra.mxu1 %vm700_vm1, %v699_v9 }
 0x1df   :  { %1157 = vmatprep.mubr.f32.mxu1 %v3665_v10 }
 0x1e1   :  { %v957_v2 = vpop.permute.xlu1 %956 }
 0x279   :  { %v2464_v3 = vpop.f32.mrf.mxu0 }
 0x27a   :  { %v884_v6 = vmul.f32 %v2464_v3, %v2464_v3 }
 0x27b   :  { %v779_v4 = vpop.f32.mrf.mxu0 }
 0x27c   :  { %v883_v9 = vmul.f32 %v779_v4, %v779_v4 }
 0x27d   :  { %v3406_v5 = vpop.f32.mrf.mxu0 }
 0x27e   :  { %v886_v14 = vmul.f32 %v3406_v5, %v3406_v5 }
 0x27f   :  { %v3408_v8 = vpop.f32.mrf.mxu0 }
 0x280   :  { %v885_v16 = vmul.f32 %v3408_v8, %v3408_v8 }
 0x29a   :  { %v2478_v7 = vpop.f32.mrf.mxu1 }
 0x29b   :  { %v888_v11 = vsub.f32 %v2478_v7, %v884_v6 }
 0x29c   :  { %v864_v12 = vpop.f32.mrf.mxu1 }
 0x29d   :  { %v892_v13 = vmax.f32 %v888_v11, 0.0  ;;  %v887_v15 = vsub.f32 %v864_v12, %v883_v9 }
 0x29e   :  { %v2481_v17 = vpop.f32.mrf.mxu1 }
 0x29f   :  { %v891_v18 = vmax.f32 %v887_v15, 0.0  ;;  %v896_v20 = vadd.f32 1e-05, %v892_v13  ;;  %v890_v22 = vsub.f32 %v2481_v17, %v886_v14 }
 0x2a0   :  { %v874_v19 = vpop.f32.mrf.mxu1 }
 0x2a1   :  { %v895_v21 = vadd.f32 1e-05, %v891_v18  ;;  %v889_v23 = vsub.f32 %v874_v19, %v885_v16  ;;  %v894_v25 = vmax.f32 %v890_v22, 0.0 }
 0x2a3   :  { %2493 = vrsqrt.f32 %v895_v21  ;;  %v893_v24 = vmax.f32 %v889_v23, 0.0  ;;  %v898_v27 = vadd.f32 1e-05, %v894_v25 }
 0x2a4   :  { %2495 = vrsqrt.f32 %v896_v20 }
 0x2a5   :  { %v897_v26 = vadd.f32 1e-05, %v893_v24 }
 0x2a7   :  { %2497 = vrsqrt.f32 %v897_v26 }
 0x2a8   :  { %2499 = vrsqrt.f32 %v898_v27 }
 0x2b0   :  { %v2494_v29 = vpop.eup %2493 }
 0x2b1   :  { %v927_v30 = vmul.f32 %v2494_v29, %v910_v28  ;;  %v2496_v31 = vpop.eup %2495 }
 0x2b2   :  { %v928_v33 = vmul.f32 %v2496_v31, %v915_v32 }
 0x2b3   :  { %2212 = vmatmul.mubr.msk.f32.vlgmr.msra.gmra.mxu0 %vm982_vm3, %v927_v30  ;;  %2218 = vmatmul.mubr.msk.f32.vlgmr.msra.gmra.mxu1 %vm982_vm3, %v927_v30  ;;  %v935_v56 = vmul.f32 %v927_v30, %v779_v4 }
 0x2b4   :  { %1074 = vmatprep.mubr.f32.mxu0 %v3665_v10  ;;  %1163 = vmatprep.mubr.f32.mxu1 %v3665_v10  ;;  %v2498_v49 = vpop.eup %2497  ;;  %v936_v58 = vmul.f32 %v2464_v3, %v928_v33 }
 0x2b5   :  { %2223 = vmatpush1.msk.msra.mxu0 %vm995_vm2, %v972_v63  ;;  %2229 = vmatpush1.msk.msra.mxu1 %vm995_vm2, %v979_v0  ;;  %v929_v51 = vmul.f32 %v2498_v49, %v920_v50  ;;  %v2500_v53 = vpop.eup %2499  ;;  %v959_v59 = vsub.f32 %v942_v57, %v935_v56  ;;  %v952_v63 = vpop.permute.xlu0 %951 }
 0x2b6   :  { %v930_v55 = vmul.f32 %v2500_v53, %v925_v54  ;;  %v960_v61 = vsub.f32 %v947_v60, %v936_v58 }
 0x2b7   :  { %2213 = vmatmul.mubr.msk.f32.gmra.mxu0 %vm982_vm3, %v928_v33  ;;  %2219 = vmatmul.mubr.msk.f32.gmra.mxu1 %vm982_vm3, %v928_v33  ;;  %v937_v62 = vmul.f32 %v929_v51, %v3408_v8 }
 0x2b8   :  { %1080 = vmatprep.mubr.f32.mxu0 %v3665_v10  ;;  %1169 = vmatprep.mubr.f32.mxu1 %v3665_v10  ;;  %v938_v0 = vmul.f32 %v3406_v5, %v930_v55 }
 0x2b9   :  { %v961_v1 = vsub.f32 %v952_v63, %v937_v62 }
 0x2ba   :  { %v962_v3 = vsub.f32 %v957_v2, %v938_v0 }
 0x2bb   :  { %2214 = vmatmul.mubr.msk.f32.gmra.mxu0 %vm982_vm3, %v929_v51  ;;  %2220 = vmatmul.mubr.msk.f32.gmra.mxu1 %vm982_vm3, %v929_v51 }
 0x2bc   :  { %1086 = vmatprep.mubr.f32.mxu0 %v3665_v10  ;;  %1175 = vmatprep.mubr.f32.mxu1 %v3665_v10 }
 0x2bf   :  { %2215 = vmatmul.mubr.msk.f32.gmra.mxu0 %vm982_vm3, %v930_v55  ;;  %2221 = vmatmul.mubr.msk.f32.gmra.mxu1 %vm982_vm3, %v930_v55 }
 0x2c0   :  { %1258 = vmatprep.mubr.f32.mxu0 %v3665_v10  ;;  %1347 = vmatprep.mubr.f32.mxu1 %v3665_v10 }
 0x2c3   :  { %2224 = vmatmul.mubr.msk.f32.vlgmr.msra.gmra.mxu0 %vm982_vm3, %v959_v59  ;;  %2230 = vmatmul.mubr.msk.f32.vlgmr.msra.gmra.mxu1 %vm982_vm3, %v959_v59 }
 0x2c4   :  { %1264 = vmatprep.mubr.f32.mxu0 %v3665_v10  ;;  %1353 = vmatprep.mubr.f32.mxu1 %v3665_v10 }
 0x2c7   :  { %2225 = vmatmul.mubr.msk.f32.gmra.mxu0 %vm982_vm3, %v960_v61  ;;  %2231 = vmatmul.mubr.msk.f32.gmra.mxu1 %vm982_vm3, %v960_v61 }
 0x2c8   :  { %1270 = vmatprep.mubr.f32.mxu0 %v3665_v10  ;;  %1359 = vmatprep.mubr.f32.mxu1 %v3665_v10 }
 0x2cb   :  { %2226 = vmatmul.mubr.msk.f32.gmra.mxu0 %vm982_vm3, %v961_v1  ;;  %2232 = vmatmul.mubr.msk.f32.gmra.mxu1 %vm982_vm3, %v961_v1 }
 0x2cc   :  { %1276 = vmatprep.mubr.f32.mxu0 %v3665_v10  ;;  %1365 = vmatprep.mubr.f32.mxu1 %v3665_v10 }
 0x2cf   :  { %2227 = vmatmul.mubr.msk.f32.gmra.mxu0 %vm982_vm3, %v962_v3  ;;  %2233 = vmatmul.mubr.msk.f32.gmra.mxu1 %vm982_vm3, %v962_v3 }
 0x2d0   :  { %1604 = vmatprep.mubr.f32.mxu0 %v3665_v10  ;;  %1693 = vmatprep.mubr.f32.mxu1 %v3665_v10 }
 0x373   :  { %v1070_v4 = vpop.f32.mrf.mxu0  ;;  %v1159_v5 = vpop.f32.mrf.mxu1 }
 0x374   :  { %v1372_v21 = vmul.f32 %v1070_v4, %v3185_v42  ;;  %v1374_v33 = vmul.f32 %v1159_v5, %v3187_v47 }
 0x375   :  { %v1072_v6 = vpop.f32.mrf.mxu0  ;;  %v1161_v7 = vpop.f32.mrf.mxu1 }
 0x376   :  { %v1373_v24 = vmul.f32 %v1072_v6, %v3189_v36  ;;  %v1375_v42 = vmul.f32 %v1161_v7, %v3191_v35 }
 0x377   :  { %v1076_v8 = vpop.f32.mrf.mxu0  ;;  %v1165_v9 = vpop.f32.mrf.mxu1 }
 0x378   :  { %v1376_v29 = vmul.f32 %v1076_v8, %v3195_v34  ;;  %v1378_v50 = vmul.f32 %v1165_v9, %v3197_v52 }
 0x379   :  { %v1078_v11 = vpop.f32.mrf.mxu0  ;;  %v1167_v12 = vpop.f32.mrf.mxu1 }
 0x37a   :  { %v1377_v49 = vmul.f32 %v1078_v11, %v3205_v38  ;;  %v1379_v51 = vmul.f32 %v1167_v12, %v3207_v39 }
 0x37b   :  { %v1082_v13 = vpop.f32.mrf.mxu0  ;;  %v1171_v14 = vpop.f32.mrf.mxu1 }
 0x37c   :  { %v1380_v53 = vmul.f32 %v1082_v13, %v3213_v37  ;;  %v1382_v56 = vmul.f32 %v1171_v14, %v3215_v40 }
 0x37d   :  { %v1084_v15 = vpop.f32.mrf.mxu0  ;;  %v1173_v16 = vpop.f32.mrf.mxu1 }
 0x37e   :  { %v1381_v47 = vmul.f32 %v1084_v15, %v3221_v41  ;;  %v1383_v38 = vmul.f32 %v1173_v16, %v3223_v43 }
 0x37f   :  { %v1088_v17 = vpop.f32.mrf.mxu0  ;;  %v1177_v18 = vpop.f32.mrf.mxu1 }
 0x380   :  { %v1384_v52 = vmul.f32 %v1088_v17, %v3231_v44  ;;  %v1386_v60 = vmul.f32 %v1177_v18, %v3233_v45 }
 0x381   :  { %v1090_v19 = vpop.f32.mrf.mxu0  ;;  %v1179_v20 = vpop.f32.mrf.mxu1 }
 0x382   :  { %v1385_v41 = vmul.f32 %v1090_v19, %v3243_v46  ;;  %v1387_v63 = vmul.f32 %v1179_v20, %v3245_v48 }
 0x383   :  { %v1260_v22 = vpop.f32.mrf.mxu0  ;;  %v1349_v23 = vpop.f32.mrf.mxu1 }
 0x384   :  { %v3452_v25 = vadd.f32 %v1372_v21, %v1260_v22  ;;  %v3482_v0 = vadd.f32 %v1374_v33, %v1349_v23 }
 0x385   :  { %v1262_v26 = vpop.f32.mrf.mxu0  ;;  %v1351_v27 = vpop.f32.mrf.mxu1 }
 0x386   :  { %v3454_v28 = vadd.f32 %v1373_v24, %v1262_v26  ;;  %v1404_v30 = vsub.f32 0.0, %v3452_v25  ;;  %v3469_v57 = vadd.f32 %v1375_v42, %v1351_v27  ;;  %v1406_v42 = vsub.f32 0.0, %v3482_v0 }
 0x387   :  { %v1266_v31 = vpop.f32.mrf.mxu0  ;;  %v1355_v32 = vpop.f32.mrf.mxu1 }
 0x388   :  { %v1405_v36 = vsub.f32 0.0, %v3454_v28  ;;  %v3465_v54 = vadd.f32 %v1376_v29, %v1266_v31  ;;  %v1420_v58 = vmul.f32 1.442695, %v1404_v30  ;;  %v1407_v2 = vsub.f32 0.0, %v3469_v57 }
 0x389   :  { %v1268_v34 = vpop.f32.mrf.mxu0  ;;  %v1357_v55 = vpop.f32.mrf.mxu1  ;;  %v3490_v5 = vadd.f32 %v1378_v50, %v1355_v32 }
 0x38a   :  { %v3471_v35 = vadd.f32 %v1377_v49, %v1268_v34  ;;  %v1408_v39 = vsub.f32 0.0, %v3465_v54  ;;  %v1422_v61 = vmul.f32 1.442695, %v1405_v36  ;;  %2501 = vpow2.f32 %v1420_v58 }
 0x38b   :  { %v1272_v37 = vpop.f32.mrf.mxu0  ;;  %v1361_v59 = vpop.f32.mrf.mxu1  ;;  %v3494_v8 = vadd.f32 %v1379_v51, %v1357_v55  ;;  %v1410_v27 = vsub.f32 0.0, %v3490_v5  ;;  %v1426_v31 = vmul.f32 1.442695, %v1407_v2 }
 0x38c   :  { %v1409_v40 = vsub.f32 0.0, %v3471_v35  ;;  %v3478_v62 = vadd.f32 %v1380_v53, %v1272_v37  ;;  %v3484_v43 = vadd.f32 %v1382_v56, %v1361_v59  ;;  %v1428_v3 = vmul.f32 1.442695, %v1408_v39 }
 0x38d   :  { %v1274_v44 = vpop.f32.mrf.mxu0  ;;  %v1363_v1 = vpop.f32.mrf.mxu1  ;;  %2503 = vpow2.f32 %v1422_v61  ;;  %v1411_v24 = vsub.f32 0.0, %v3494_v8  ;;  %v1432_v50 = vmul.f32 1.442695, %v1410_v27  ;;  %v1424_v53 = vmul.f32 1.442695, %v1406_v42 }
 0x38e   :  { %v1412_v45 = vsub.f32 0.0, %v3478_v62  ;;  %v3488_v4 = vadd.f32 %v1381_v47, %v1274_v44  ;;  %v1430_v6 = vmul.f32 1.442695, %v1409_v40  ;;  %v3492_v46 = vadd.f32 %v1383_v38, %v1363_v1 }
 0x38f   :  { %v1278_v48 = vpop.f32.mrf.mxu0  ;;  %v1367_v7 = vpop.f32.mrf.mxu1  ;;  %v1414_v12 = vsub.f32 0.0, %v3484_v43  ;;  %2505 = vpow2.f32 %v1428_v3  ;;  %v1434_v36 = vmul.f32 1.442695, %v1411_v24 }
 0x390   :  { %v1436_v9 = vmul.f32 1.442695, %v1412_v45  ;;  %v1413_v11 = vsub.f32 0.0, %v3488_v4  ;;  %v1415_v13 = vsub.f32 0.0, %v3492_v46  ;;  %v3499_v14 = vadd.f32 %v1384_v52, %v1278_v48 }
 0x391   :  { %v3501_v15 = vadd.f32 %v1386_v60, %v1367_v7  ;;  %v1280_v16 = vpop.f32.mrf.mxu0  ;;  %v1369_v17 = vpop.f32.mrf.mxu1  ;;  %2507 = vpow2.f32 %v1430_v6  ;;  %v1440_v49 = vmul.f32 1.442695, %v1414_v12 }
 0x392   :  { %v1438_v18 = vmul.f32 1.442695, %v1413_v11  ;;  %v3503_v19 = vadd.f32 %v1385_v41, %v1280_v16  ;;  %v3505_v20 = vadd.f32 %v1387_v63, %v1369_v17  ;;  %v1442_v21 = vmul.f32 1.442695, %v1415_v13 }
 0x393   :  { %v1416_v22 = vsub.f32 0.0, %v3499_v14  ;;  %v1418_v23 = vsub.f32 0.0, %v3501_v15  ;;  %2509 = vpow2.f32 %v1436_v9 }
 0x394   :  { %v1417_v26 = vsub.f32 0.0, %v3503_v19  ;;  %2511 = vpow2.f32 %v1438_v18  ;;  %v1419_v33 = vsub.f32 0.0, %v3505_v20 }
 0x395   :  { %v1444_v29 = vmul.f32 1.442695, %v1416_v22  ;;  %v1448_v30 = vmul.f32 1.442695, %v1418_v23  ;;  %2513 = vpow2.f32 %v1442_v21 }
 0x396   :  { %v1446_v32 = vmul.f32 1.442695, %v1417_v26  ;;  %v1450_v51 = vmul.f32 1.442695, %v1419_v33 }
 0x397   :  { %2515 = vpow2.f32 %v1444_v29  ;;  %v2502_v34 = vpop.eup %2501 }
 0x398   :  { %2517 = vpow2.f32 %v1448_v30  ;;  %v1452_v38 = vadd.f32 1.0, %v2502_v34 }
 0x399   :  { %2519 = vpow2.f32 %v1446_v32 }
 0x39a   :  { %2521 = vpow2.f32 %v1426_v31  ;;  %v2504_v55 = vpop.eup %2503 }
 0x39b   :  { %2523 = vpow2.f32 %v1440_v49  ;;  %v1453_v58 = vadd.f32 1.0, %v2504_v55 }
 0x39c   :  { %2525 = vpow2.f32 %v1434_v36  ;;  %v2506_v56 = vpop.eup %2505 }
 0x39d   :  { %2527 = vpow2.f32 %v1432_v50  ;;  %v1456_v37 = vadd.f32 1.0, %v2506_v56 }
 0x39e   :  { %2529 = vpow2.f32 %v1450_v51  ;;  %v2508_v47 = vpop.eup %2507 }
 0x39f   :  { %2531 = vpow2.f32 %v1424_v53  ;;  %v1457_v2 = vadd.f32 1.0, %v2508_v47 }
 0x3a0   :  { %v2510_v52 = vpop.eup %2509  ;;  %2533 = vrcp.f32 %v1452_v38 }
 0x3a1   :  { %v2512_v39 = vpop.eup %2511  ;;  %2535 = vrcp.f32 %v1453_v58  ;;  %v1460_v44 = vadd.f32 1.0, %v2510_v52 }
 0x3a2   :  { %v2514_v59 = vpop.eup %2513  ;;  %v1461_v60 = vadd.f32 1.0, %v2512_v39  ;;  %2537 = vrcp.f32 %v1456_v37 }
 0x3a3   :  { %v1463_v6 = vadd.f32 1.0, %v2514_v59 }
 0x3a4   :  { %v2516_v61 = vpop.eup %2515  ;;  %2539 = vrcp.f32 %v1461_v60 }
 0x3a5   :  { %v2518_v40 = vpop.eup %2517  ;;  %v1464_v41 = vadd.f32 1.0, %v2516_v61 }
 0x3a6   :  { %v2520_v63 = vpop.eup %2519  ;;  %v1466_v7 = vadd.f32 1.0, %v2518_v40 }
 0x3a7   :  { %v2522_v1 = vpop.eup %2521  ;;  %v1465_v3 = vadd.f32 1.0, %v2520_v63  ;;  %2541 = vrcp.f32 %v1464_v41 }
 0x3a8   :  { %v2524_v45 = vpop.eup %2523  ;;  %v1455_v21 = vadd.f32 1.0, %v2522_v1 }
 0x3a9   :  { %v2526_v48 = vpop.eup %2525  ;;  %2543 = vrcp.f32 %v1465_v3  ;;  %v1462_v12 = vadd.f32 1.0, %v2524_v45  ;;  %v1521_v3 = vpop.permute.xlu1 %1520 }
 0x3aa   :  { %v2528_v9 = vpop.eup %2527  ;;  %2545 = vrcp.f32 %v1460_v44  ;;  %v1459_v16 = vadd.f32 1.0, %v2526_v48  ;;  %v1526_v44 = vpop.permute.xlu0 %1525 }
 0x3ab   :  { %v2530_v11 = vpop.eup %2529  ;;  %2547 = vrcp.f32 %v1457_v2  ;;  %v1458_v18 = vadd.f32 1.0, %v2528_v9 }
 0x3ac   :  { %v2532_v13 = vpop.eup %2531  ;;  %2549 = vrcp.f32 %v1463_v6  ;;  %v1467_v17 = vadd.f32 1.0, %v2530_v11 }
 0x3ad   :  { %2551 = vrcp.f32 %v1466_v7  ;;  %v1454_v22 = vadd.f32 1.0, %v2532_v13  ;;  %v2534_v23 = vpop.eup %2533 }
 0x3ae   :  { %2553 = vrcp.f32 %v1467_v17  ;;  %v2536_v24 = vpop.eup %2535 }
 0x3af   :  { %2555 = vrcp.f32 %v1462_v12  ;;  %v2538_v26 = vpop.eup %2537  ;;  %v1516_v12 = vpop.permute.xlu0 %1515 }
 0x3b0   :  { %2557 = vrcp.f32 %v1459_v16  ;;  %v1488_v56 = vmul.f32 %v2538_v26, %v3465_v54  ;;  %v1500_v54 = vld [vmem:[%s3634_s6] sm:$0xff] }
 0x3b1   :  { %2559 = vrcp.f32 %v1458_v18  ;;  %v2540_v27 = vpop.eup %2539  ;;  %v1511_v18 = vpop.permute.xlu1 %1510 }
 0x3b2   :  { %2561 = vrcp.f32 %v1455_v21  ;;  %v1493_v36 = vmul.f32 %v2540_v27, %v3488_v4 }
 0x3b3   :  { %2563 = vrcp.f32 %v1454_v22 }
 0x3b4   :  { %v2542_v29 = vpop.eup %2541 }
 0x3b5   :  { %v1496_v42 = vmul.f32 %v2542_v29, %v3499_v14  ;;  %v1485_v14 = vmul.f32 %v2536_v24, %v3454_v28 }
 0x3b6   :  { %v2544_v30 = vpop.eup %2543 }
 0x3b7   :  { %v2546_v31 = vpop.eup %2545  ;;  %v1497_v32 = vmul.f32 %v2544_v30, %v3503_v19  ;;  %v1724_v30 = vld [vmem:[%s3637_s9] sm:$0xff] }
 0x3b8   :  { %v2548_v33 = vpop.eup %2547  ;;  %v1492_v51 = vmul.f32 %v2546_v31, %v3478_v62  ;;  %v1484_v62 = vmul.f32 %v2534_v23, %v3452_v25  ;;  %v1722_v23 = vld [vmem:[%s3629_s1] sm:$0xff] }
 0x3b9   :  { %v2550_v49 = vpop.eup %2549  ;;  %1564 = vmatprep.subr.mxu0 %v1497_v32  ;;  %v1489_v34 = vmul.f32 %v2548_v33, %v3471_v35  ;;  %v1920_v32 = vcombine.high %v1722_v23, %v1722_v23 }
 0x3ba   :  { %v2552_v50 = vpop.eup %2551  ;;  %1565 = vmatpush1.msra.mxu0 %v1496_v42  ;;  %v1495_v52 = vmul.f32 %v2550_v49, %v3492_v46  ;;  %v1723_v42 = vld [vmem:[%s3629_s1 + $0x8] sm:$0xff] }
 0x3bb   :  { %v2554_v53 = vpop.eup %2553  ;;  %1566 = vmatprep.subr.mxu0 %v1493_v36  ;;  %v1498_v4 = vmul.f32 %v2552_v50, %v3501_v15  ;;  %v1725_v50 = vld [vmem:[%s3637_s9 + $0x8] sm:$0xff] }
 0x3bc   :  { %v2556_v55 = vpop.eup %2555  ;;  %v1499_v19 = vmul.f32 %v2554_v53, %v3505_v20  ;;  %1567 = vmatpush1.msra.mxu0 %v1492_v51  ;;  %v1921_v53 = vcombine.high %v1723_v42, %v1723_v42 }
 0x3bd   :  { %v2558_v47 = vpop.eup %2557  ;;  %1568 = vmatprep.subr.mxu0 %v1489_v34  ;;  %v1494_v20 = vmul.f32 %v2556_v55, %v3484_v43  ;;  %v1501_v43 = vld [vmem:[%s3634_s6 + $0x8] sm:$0xff]  ;;  %v1726_v34 = vld [vmem:[%s3637_s9 + $0x10] sm:$0xff]  ;;  %v1727_v55 = vld [vmem:[%s3637_s9 + $0x18] sm:$0xff] }
 0x3be   :  { %v2560_v38 = vpop.eup %2559  ;;  %1653 = vmatprep.subr.mxu1 %v1499_v19  ;;  %1569 = vmatpush1.msra.mxu0 %v1488_v56  ;;  %v1491_v15 = vmul.f32 %v2558_v47, %v3494_v8  ;;  %v1718_v56 = vld [vmem:[%s3636_s8] sm:$0xff]  ;;  %v1719_v19 = vld [vmem:[%s3636_s8 + $0x8] sm:$0xff]  ;;  %v1720_v47 = vld [vmem:[%s3636_s8 + $0x10] sm:$0xff] }
 0x3bf   :  { %v2562_v35 = vpop.eup %2561  ;;  %1654 = vmatpush1.msra.mxu1 %v1498_v4  ;;  %1570 = vmatprep.subr.mxu0 %v1485_v14  ;;  %v1490_v25 = vmul.f32 %v2560_v38, %v3490_v5  ;;  %v1721_v14 = vld [vmem:[%s3636_s8 + $0x18] sm:$0xff]  ;;  %s2590_s8 = smov [#allocation2]  }
 0x3c0   :  { %v2564_v28 = vpop.eup %2563  ;;  %1655 = vmatprep.subr.mxu1 %v1495_v52  ;;  %1571 = vmatpush1.msra.mxu0 %v1484_v62  ;;  %v1487_v46 = vmul.f32 %v2562_v35, %v3469_v57  ;;  %v1502_v57 = vld [vmem:[%s3634_s6 + $0x10] sm:$0xff]  ;;  %s2183_s2 = sshll.u32 %s2590_s8, 4  ;;  %s2184_s2 = int_to_ptr.vmem [resolvable:$true] %s2183_s2 }
 0x3c1   :  { %1656 = vmatpush1.msra.mxu1 %v1494_v20  ;;  %2234 = vmatmul.mubr.msk.f32.vlgmr.msra.gmra.mxu0 %vm700_vm1, %v1500_v54  ;;  %v1486_v58 = vmul.f32 %v2564_v28, %v3482_v0  ;;  %v1503_v0 = vld [vmem:[%s3634_s6 + $0x18] sm:$0xff]  ;;  %s2565_s12 = scalar_lea.vmem %s2184_s2, 2048  ;;  %p2570_p1 = scmp.lt.s32.totalorder %s2184_s2, %s2184_s2 }
 0x3c2   :  { %1657 = vmatprep.subr.mxu1 %v1491_v15  ;;  %1610 = vmatprep.mubr.f32.mxu0 %v3665_v10  ;;  %p2566_p0 = scmp.ne.s32.totalorder %s2184_s2, %s2565_s12  ;;  %p2571_p2 = scmp.lt.s32.totalorder %s2565_s12, %s2565_s12 }
 0x3c3   :  { %1658 = vmatpush1.msra.mxu1 %v1490_v25 }
 0x3c4   :  { %1659 = vmatprep.subr.mxu1 %v1487_v46  ;;  %p2572_p3 = por %p2571_p2, %p2570_p1 }
 0x3c5   :  { %1660 = vmatpush1.msra.mxu1 %v1486_v58  ;;  %2235 = vmatmul.mubr.msk.f32.gmra.mxu0 %vm700_vm1, %v1501_v43 }
 0x3c6   :  { %2238 = vmatmul.mubr.msk.f32.vlgmr.msra.gmra.mxu1 %vm700_vm1, %v1500_v54  ;;  %1616 = vmatprep.mubr.f32.mxu0 %v3665_v10  ;;  %p2573_p4 = pnand %p2572_p3, %p2566_p0 }
 0x3c7   :  { %1699 = vmatprep.mubr.f32.mxu1 %v3665_v10 }
 0x3c9   :  { %2236 = vmatmul.mubr.msk.f32.gmra.mxu0 %vm700_vm1, %v1502_v57 }
 0x3ca   :  { %2239 = vmatmul.mubr.msk.f32.gmra.mxu1 %vm700_vm1, %v1501_v43  ;;  %1622 = vmatprep.mubr.f32.mxu0 %v3665_v10 }
 0x3cb   :  { %1705 = vmatprep.mubr.f32.mxu1 %v3665_v10 }
 0x3cd   :  { %2237 = vmatmul.mubr.msk.f32.gmra.mxu0 %vm700_vm1, %v1503_v0 }
 0x3ce   :  { %2240 = vmatmul.mubr.msk.f32.gmra.mxu1 %vm700_vm1, %v1502_v57  ;;  %1804 = vmatprep.mubr.f32.mxu0 %v3665_v10 }
 0x3cf   :  { %1711 = vmatprep.mubr.f32.mxu1 %v3665_v10 }
 0x3d2   :  { %2241 = vmatmul.mubr.msk.f32.gmra.mxu1 %vm700_vm1, %v1503_v0 }
 0x3d3   :  { %1893 = vmatprep.mubr.f32.mxu1 %v3665_v10 }
 0x481   :  { %v1606_v5 = vpop.f32.mrf.mxu0 }
 0x482   :  { %v1607_v27 = vadd.f32 %v1606_v5, %v1511_v18 }
 0x483   :  { %v1608_v8 = vpop.f32.mrf.mxu0 }
 0x484   :  { %v1609_v24 = vadd.f32 %v1608_v8, %v1511_v18 }
 0x485   :  { %v1612_v39 = vpop.f32.mrf.mxu0 }
 0x486   :  { %v1695_v37 = vpop.f32.mrf.mxu1  ;;  %v1613_v21 = vadd.f32 %v1612_v39, %v1516_v12 }
 0x487   :  { %v1614_v59 = vpop.f32.mrf.mxu0  ;;  %v1696_v51 = vadd.f32 %v1695_v37, %v1511_v18 }
 0x488   :  { %v1697_v60 = vpop.f32.mrf.mxu1  ;;  %v1615_v16 = vadd.f32 %v1614_v59, %v1516_v12 }
 0x489   :  { %v1618_v61 = vpop.f32.mrf.mxu0  ;;  %v1698_v36 = vadd.f32 %v1697_v60, %v1511_v18 }
 0x48a   :  { %v1701_v40 = vpop.f32.mrf.mxu1  ;;  %v1619_v13 = vadd.f32 %v1618_v61, %v1521_v3 }
 0x48b   :  { %v1620_v41 = vpop.f32.mrf.mxu0  ;;  %v1702_v49 = vadd.f32 %v1701_v40, %v1516_v12 }
 0x48c   :  { %v1703_v63 = vpop.f32.mrf.mxu1  ;;  %v1621_v9 = vadd.f32 %v1620_v41, %v1521_v3 }
 0x48d   :  { %v1624_v1 = vpop.f32.mrf.mxu0  ;;  %v1704_v33 = vadd.f32 %v1703_v63, %v1516_v12 }
 0x48e   :  { %v1707_v2 = vpop.f32.mrf.mxu1  ;;  %v1625_v7 = vadd.f32 %v1624_v1, %v1526_v44 }
 0x48f   :  { %v1626_v45 = vpop.f32.mrf.mxu0  ;;  %v1708_v31 = vadd.f32 %v1707_v2, %v1521_v3 }
 0x490   :  { %v1709_v6 = vpop.f32.mrf.mxu1  ;;  %v1627_v48 = vadd.f32 %v1626_v45, %v1526_v44 }
 0x491   :  { %v1710_v29 = vadd.f32 %v1709_v6, %v1521_v3 }
 0x492   :  { %v1713_v11 = vpop.f32.mrf.mxu1  ;;  %1764 = vmatprep.subr.mxu0 %v1627_v48 }
 0x493   :  { %1765 = vmatpush1.msra.mxu0 %v1625_v7  ;;  %v1714_v26 = vadd.f32 %v1713_v11, %v1526_v44 }
 0x494   :  { %v1715_v17 = vpop.f32.mrf.mxu1  ;;  %1766 = vmatprep.subr.mxu0 %v1621_v9 }
 0x495   :  { %v1716_v22 = vadd.f32 %v1715_v17, %v1526_v44  ;;  %1767 = vmatpush1.msra.mxu0 %v1619_v13  ;;  %v2134_v44 = vpop.permute.xlu1 %2133 }
 0x496   :  { %1768 = vmatprep.subr.mxu0 %v1615_v16 }
 0x497   :  { %1853 = vmatprep.subr.mxu1 %v1716_v22  ;;  %1769 = vmatpush1.msra.mxu0 %v1613_v21 }
 0x498   :  { %1854 = vmatpush1.msra.mxu1 %v1714_v26  ;;  %1770 = vmatprep.subr.mxu0 %v1609_v24 }
 0x499   :  { %1855 = vmatprep.subr.mxu1 %v1710_v29  ;;  %1771 = vmatpush1.msra.mxu0 %v1607_v27 }
 0x49a   :  { %1856 = vmatpush1.msra.mxu1 %v1708_v31  ;;  %2242 = vmatmul.mubr.msk.f32.vlgmr.msra.gmra.mxu0 %vm700_vm1, %v1724_v30 }
 0x49b   :  { %1857 = vmatprep.subr.mxu1 %v1704_v33  ;;  %1810 = vmatprep.mubr.f32.mxu0 %v3665_v10  ;;  %v2144_v33 = vpop.permute.xlu1 %2143 }
 0x49c   :  { %1858 = vmatpush1.msra.mxu1 %v1702_v49  ;;  %2250 = vmatprep.subr.msk.mxu0 %vm1935_vm4, %v1920_v32 }
 0x49d   :  { %1859 = vmatprep.subr.mxu1 %v1698_v36  ;;  %2251 = vmatpush1.msk.msra.mxu0 %vm1935_vm4, %v1722_v23 }
 0x49e   :  { %1860 = vmatpush1.msra.mxu1 %v1696_v51  ;;  %2243 = vmatmul.mubr.msk.f32.gmra.mxu0 %vm700_vm1, %v1725_v50 }
 0x49f   :  { %2246 = vmatmul.mubr.msk.f32.vlgmr.msra.gmra.mxu1 %vm700_vm1, %v1724_v30  ;;  %1816 = vmatprep.mubr.f32.mxu0 %v3665_v10 }
 0x4a0   :  { %1899 = vmatprep.mubr.f32.mxu1 %v3665_v10  ;;  %2256 = vmatprep.subr.msk.mxu1 %vm1935_vm4, %v1921_v53 }
 0x4a1   :  { %2257 = vmatpush1.msk.msra.mxu1 %vm1935_vm4, %v1723_v42 }
 0x4a2   :  { %2244 = vmatmul.mubr.msk.f32.gmra.mxu0 %vm700_vm1, %v1726_v34 }
 0x4a3   :  { %2247 = vmatmul.mubr.msk.f32.gmra.mxu1 %vm700_vm1, %v1725_v50  ;;  %1822 = vmatprep.mubr.f32.mxu0 %v3665_v10 }
 0x4a4   :  { %1905 = vmatprep.mubr.f32.mxu1 %v3665_v10 }
 0x4a6   :  { %2245 = vmatmul.mubr.msk.f32.gmra.mxu0 %vm700_vm1, %v1727_v55 }
 0x4a7   :  { %2248 = vmatmul.mubr.msk.f32.gmra.mxu1 %vm700_vm1, %v1726_v34  ;;  %2008 = vmatprep.mubr.f32.mxu0 %v3665_v10 }
 0x4a8   :  { %1911 = vmatprep.mubr.f32.mxu1 %v3665_v10 }
 0x4aa   :  { %2252 = vmatmul.mubr.msk.f32.vlgmr.msra.gmra.mxu0 %vm1922_vm5, %v1718_v56 }
 0x4ab   :  { %2249 = vmatmul.mubr.msk.f32.gmra.mxu1 %vm700_vm1, %v1727_v55  ;;  %2014 = vmatprep.mubr.f32.mxu0 %v3665_v10 }
 0x4ac   :  { %2097 = vmatprep.mubr.f32.mxu1 %v3665_v10 }
 0x4ae   :  { %2253 = vmatmul.mubr.msk.f32.gmra.mxu0 %vm1922_vm5, %v1719_v19 }
 0x4af   :  { %2258 = vmatmul.mubr.msk.f32.vlgmr.msra.gmra.mxu1 %vm1922_vm5, %v1718_v56  ;;  %2020 = vmatprep.mubr.f32.mxu0 %v3665_v10 }
 0x4b0   :  { %2103 = vmatprep.mubr.f32.mxu1 %v3665_v10 }
 0x4b2   :  { %2254 = vmatmul.mubr.msk.f32.gmra.mxu0 %vm1922_vm5, %v1720_v47 }
 0x4b3   :  { %2259 = vmatmul.mubr.msk.f32.gmra.mxu1 %vm1922_vm5, %v1719_v19  ;;  %2026 = vmatprep.mubr.f32.mxu0 %v3665_v10 }
 0x4b4   :  { %2109 = vmatprep.mubr.f32.mxu1 %v3665_v10 }
 0x4b6   :  { %2255 = vmatmul.mubr.msk.f32.gmra.mxu0 %vm1922_vm5, %v1721_v14 }
 0x4b7   :  { %2260 = vmatmul.mubr.msk.f32.gmra.mxu1 %vm1922_vm5, %v1720_v47 }
 0x4b8   :  { %2115 = vmatprep.mubr.f32.mxu1 %v3665_v10  ;;  %v2129_v10 = vpop.permute.xlu0 %2128 }
 0x4bb   :  { %2261 = vmatmul.mubr.msk.f32.gmra.mxu1 %vm1922_vm5, %v1721_v14 }
 0x4bc   :  { %v2139_v16 = vpop.permute.xlu0 %2138 }
 0x55a   :  { %v1806_v4 = vpop.f32.mrf.mxu0 }
 0x55c   :  { %v1808_v38 = vpop.f32.mrf.mxu0 }
 0x55e   :  { %v1812_v62 = vpop.f32.mrf.mxu0 }
 0x55f   :  { %v1895_v52 = vpop.f32.mrf.mxu1 }
 0x560   :  { %v1814_v54 = vpop.f32.mrf.mxu0 }
 0x561   :  { %v1897_v35 = vpop.f32.mrf.mxu1 }
 0x562   :  { %v1818_v20 = vpop.f32.mrf.mxu0 }
 0x563   :  { %v1901_v28 = vpop.f32.mrf.mxu1 }
 0x564   :  { %v1820_v15 = vpop.f32.mrf.mxu0 }
 0x565   :  { %v1903_v25 = vpop.f32.mrf.mxu1 }
 0x566   :  { %v1824_v46 = vpop.f32.mrf.mxu0 }
 0x567   :  { %v1907_v43 = vpop.f32.mrf.mxu1 }
 0x568   :  { %v1826_v58 = vpop.f32.mrf.mxu0 }
 0x569   :  { %v1909_v57 = vpop.f32.mrf.mxu1 }
 0x56a   :  { %v2010_v0 = vpop.f32.mrf.mxu0 }
 0x56b   :  { %v1913_v5 = vpop.f32.mrf.mxu1  ;;  %v2011_v8 = vadd.f32 %v2010_v0, %v1806_v4 }
 0x56c   :  { %v2012_v39 = vpop.f32.mrf.mxu0 }
 0x56d   :  { %v3622_v37 = vpop.f32.mrf.mxu1  ;;  %v2146_v59 = vadd.f32 %v2129_v10, %v2011_v8  ;;  %v2013_v60 = vadd.f32 %v2012_v39, %v1808_v38 }
 0x56e   :  { %v2016_v61 = vpop.f32.mrf.mxu0 }
 0x56f   :  { %2162 = vst [vmem:[#allocation2] sm:$0xff] %v2146_v59  ;;  %v2099_v40 = vpop.f32.mrf.mxu1  ;;  %v2147_v41 = vadd.f32 %v2129_v10, %v2013_v60  ;;  %v2017_v63 = vadd.f32 %v2016_v61, %v1812_v62 }
 0x570   :  { %v2100_v1 = vadd.f32 %v2099_v40, %v1895_v52  ;;  %v2018_v2 = vpop.f32.mrf.mxu0 }
 0x571   :  { %2163 = vst [vmem:[#allocation2 + $0x8] sm:$0xff] %v2147_v41  ;;  %v2101_v3 = vpop.f32.mrf.mxu1  ;;  %v2150_v45 = vadd.f32 %v2134_v44, %v2017_v63  ;;  %v2019_v6 = vadd.f32 %v2018_v2, %v1814_v54 }
 0x572   :  { %v2148_v48 = vadd.f32 %v2129_v10, %v2100_v1  ;;  %v2102_v7 = vadd.f32 %v2101_v3, %v1897_v35  ;;  %v2022_v9 = vpop.f32.mrf.mxu0 }
 0x573   :  { %2166 = vst [vmem:[#allocation2 + $0x20] sm:$0xff] %v2150_v45  ;;  %v2105_v11 = vpop.f32.mrf.mxu1  ;;  %v2151_v12 = vadd.f32 %v2134_v44, %v2019_v6  ;;  %v2023_v13 = vadd.f32 %v2022_v9, %v1818_v20 }
 0x574   :  { %2164 = vst [vmem:[#allocation2 + $0x10] sm:$0xff] %v2148_v48  ;;  %v2149_v17 = vadd.f32 %v2129_v10, %v2102_v7  ;;  %v2106_v18 = vadd.f32 %v2105_v11, %v1901_v28  ;;  %v2024_v21 = vpop.f32.mrf.mxu0 }
 0x575   :  { %2167 = vst [vmem:[#allocation2 + $0x28] sm:$0xff] %v2151_v12  ;;  %v2107_v22 = vpop.f32.mrf.mxu1  ;;  %v2154_v23 = vadd.f32 %v2139_v16, %v2023_v13  ;;  %v2025_v24 = vadd.f32 %v2024_v21, %v1820_v15 }
 0x576   :  { %2165 = vst [vmem:[#allocation2 + $0x18] sm:$0xff] %v2149_v17  ;;  %v2152_v26 = vadd.f32 %v2134_v44, %v2106_v18  ;;  %v2108_v27 = vadd.f32 %v2107_v22, %v1903_v25  ;;  %v2028_v29 = vpop.f32.mrf.mxu0 }
 0x577   :  { %2170 = vst [vmem:[#allocation2 + $0x40] sm:$0xff] %v2154_v23  ;;  %v2111_v30 = vpop.f32.mrf.mxu1  ;;  %v2155_v31 = vadd.f32 %v2139_v16, %v2025_v24  ;;  %v2029_v32 = vadd.f32 %v2028_v29, %v1824_v46 }
 0x578   :  { %2168 = vst [vmem:[#allocation2 + $0x30] sm:$0xff] %v2152_v26  ;;  %v2153_v42 = vadd.f32 %v2134_v44, %v2108_v27  ;;  %v2112_v49 = vadd.f32 %v2111_v30, %v1907_v43  ;;  %v2030_v36 = vpop.f32.mrf.mxu0 }
 0x579   :  { %2171 = vst [vmem:[#allocation2 + $0x48] sm:$0xff] %v2155_v31  ;;  %v2113_v50 = vpop.f32.mrf.mxu1  ;;  %v2158_v51 = vadd.f32 %v2144_v33, %v2029_v32  ;;  %v2031_v53 = vadd.f32 %v2030_v36, %v1826_v58 }
 0x57a   :  { %2169 = vst [vmem:[#allocation2 + $0x38] sm:$0xff] %v2153_v42  ;;  %v2156_v34 = vadd.f32 %v2139_v16, %v2112_v49  ;;  %v2114_v55 = vadd.f32 %v2113_v50, %v1909_v57 }
 0x57b   :  { %2174 = vst [vmem:[#allocation2 + $0x60] sm:$0xff] %v2158_v51  ;;  %v2117_v56 = vpop.f32.mrf.mxu1  ;;  %v2159_v19 = vadd.f32 %v2144_v33, %v2031_v53 }
 0x57c   :  { %2172 = vst [vmem:[#allocation2 + $0x50] sm:$0xff] %v2156_v34  ;;  %v2157_v47 = vadd.f32 %v2139_v16, %v2114_v55  ;;  %v2118_v14 = vadd.f32 %v2117_v56, %v1913_v5 }
 0x57d   :  { %2175 = vst [vmem:[#allocation2 + $0x68] sm:$0xff] %v2159_v19  ;;  %v2119_v4 = vpop.f32.mrf.mxu1 }
 0x57e   :  { %2173 = vst [vmem:[#allocation2 + $0x58] sm:$0xff] %v2157_v47  ;;  %v2160_v38 = vadd.f32 %v2144_v33, %v2118_v14  ;;  %v2120_v62 = vadd.f32 %v2119_v4, %v3622_v37 }
 0x580   :  { %2176 = vst [vmem:[#allocation2 + $0x70] sm:$0xff] %v2160_v38  ;;  %v2161_v52 = vadd.f32 %v2144_v33, %v2120_v62 }
 0x582   :  { %2177 = vst [vmem:[#allocation2 + $0x78] sm:$0xff] %v2161_v52 }
 0x583   :  { %2576 = shalt.err (!%p2573_p4)
}
 0x584   :  { %s2591_s30 = smov 512   ;;  %s2592_s3 = smov 32  }
 0x585   :  { %2189 = dma.vmem_to_hbm [thread:$0]  %s2184_s2, 2048, %s3641_s13, [#allocation3], %s2591_s30, %s2591_s30, %s2592_s3  }
 0x586   :  { %2585 = dma.done.wait [#allocation3], 2048  }
 0x587   :  { %2586 = vsyncadd [#allocation3], 4294965248 }
 0x588   :  { %2193 = vsyncpa [#allocation3], 1 }

</bundles_post_ra>
